<compile_context>
chip_gen: v5e
topology: v5e:2x2
jax: 0.10.0
libtpu: 0.0.40
codegen_flags: <defaults>
</compile_context>

<pallas_src>
import functools

import jax
import jax.numpy as jnp
from jax.experimental import pallas as pl
from jax.experimental.pallas import tpu as pltpu

_VMEM_LIMIT_BYTES = 32 * 1024 * 1024      # safe on v5e/v6e/v7x; > v5e's 16 MiB default
_BLOCK_BYTES_TARGET = 2 * 1024 * 1024     # ~HBM-roofline plateau, << VMEM w/ double buffering


# --------------------------------------------------------------------------- #
# Kernels
# --------------------------------------------------------------------------- #
def _butterfly(x_ref, alpha, beta):
    """Return the 4 Haar quadrants q00, q01, q10, q11 (row-parity, col-parity).

    x_ref block: (1, 4, CT, ...spatial...) with the 4 subbands on axis 1.
    Butterfly form: 4 scalar muls + 8 add/sub instead of 16 fused ops, computed
    in the input dtype (no f32 upcast -> half the vreg pressure for bf16).
    """
    a = x_ref[0, 0] * (alpha * beta)
    b = x_ref[0, 1] * alpha
    c = x_ref[0, 2] * alpha
    d = x_ref[0, 3] * alpha
    p, m = a + b, a - b
    u, v = c + d, c - d
    return p + u, p - u, m + v, m - v


def _haar_fused_kernel(x_ref, o_ref, *, alpha, beta):
    # x_ref: (1, 4, CT, HT, W)   o_ref: (1, CT, HT, 4W)
    # o_ref row t packs output rows (2t, 2t+1): [riffle(q00,q01) | riffle(q10,q11)]
    w = x_ref.shape[-1]
    q00, q01, q10, q11 = _butterfly(x_ref, alpha, beta)

    def riffle(lo, hi):
        # z[..., 2j] = lo[..., j]; z[..., 2j+1] = hi[..., j]   (lane interleave, XLU)
        z = jnp.stack([lo, hi], axis=-1)                 # (CT, HT, W, 2)
        return z.reshape(lo.shape[:-1] + (2 * w,))       # (CT, HT, 2W)

    even_rows = riffle(q00, q01)      # output rows 2i
    odd_rows = riffle(q10, q11)       # output rows 2i+1
    o_ref[0, :, :, 0:2 * w] = even_rows.astype(o_ref.dtype)
    o_ref[0, :, :, 2 * w:4 * w] = odd_rows.astype(o_ref.dtype)


def _haar_quadrant_kernel(x_ref, o_ref, *, alpha, beta):
    # x_ref: (1, 4, C4, ST)   o_ref: (1, 2, 2, C4, ST)  -- flat spatial, dense stores
    q00, q01, q10, q11 = _butterfly(x_ref, alpha, beta)
    dt = o_ref.dtype
    o_ref[0, 0, 0] = q00.astype(dt)
    o_ref[0, 0, 1] = q01.astype(dt)
    o_ref[0, 1, 0] = q10.astype(dt)
    o_ref[0, 1, 1] = q11.astype(dt)


# --------------------------------------------------------------------------- #
# Tile-size selection (keep blocks ~<= 2 MiB, last two block dims (8,128)-legal)
# --------------------------------------------------------------------------- #
def _pick_row_tile(h, w, elem_bytes, budget):
    # Legal row tiles: multiples of 8 dividing h, or the full dim h.
    cands = sorted({h} | {d for d in range(8, h + 1, 8) if h % d == 0}, reverse=True)
    for cand in cands:
        if 4 * cand * w * elem_bytes <= budget:
            return cand
    return cands[-1]


def _pick_channel_tile(c4, ht, w, elem_bytes, budget):
    for cand in range(c4, 0, -1):
        if c4 % cand == 0 and 4 * cand * ht * w * elem_bytes <= budget:
            return cand
    return 1


def _pick_spatial_tile(c4, hw, elem_bytes, budget):
    # Legal flat-spatial tiles: multiples of 128 dividing h*w, or the full dim.
    cands = sorted({hw} | {d for d in range(128, hw + 1, 128) if hw % d == 0}, reverse=True)
    for cand in cands:
        if 4 * c4 * cand * elem_bytes <= budget:
            return cand
    return cands[-1]


# --------------------------------------------------------------------------- #
# Wrappers
# --------------------------------------------------------------------------- #
def _haar_inverse_fused(x, beta, alpha):
    b, c, h, w = x.shape
    c4 = c // 4
    x_r = x.reshape(b, 4, c4, h, w)                     # free: split channel axis
    elem = x.dtype.itemsize

    ht = _pick_row_tile(h, w, elem, _BLOCK_BYTES_TARGET)
    ct = _pick_channel_tile(c4, ht, w, elem, _BLOCK_BYTES_TARGET)
    # Keep >= 2 grid steps so both v7x TensorCores are used.
    if b * (c4 // ct) * (h // ht) < 2:
        if ht % 16 == 0:
            ht //= 2
        elif ct % 2 == 0:
            ct //= 2

    kernel = functools.partial(_haar_fused_kernel, alpha=float(alpha), beta=float(beta))
    y = pl.pallas_call(
        kernel,
        out_shape=jax.ShapeDtypeStruct((b, c4, h, 4 * w), x.dtype),
        grid=(b, c4 // ct, h // ht),
        in_specs=[
            pl.BlockSpec((1, 4, ct, ht, w), lambda bi, ci, hi: (bi, 0, ci, hi, 0)),
        ],
        out_specs=pl.BlockSpec((1, ct, ht, 4 * w), lambda bi, ci, hi: (bi, ci, hi, 0)),
        compiler_params=pltpu.CompilerParams(
            dimension_semantics=("parallel", "parallel", "parallel"),
            vmem_limit_bytes=_VMEM_LIMIT_BYTES,
        ),
    )(x_r)
    # Row i of y already holds output rows (2i, 2i+1) with columns interleaved,
    # so this reshape is contiguous (free) -- no XLA transpose pass.
    return y.reshape(b, c4, 2 * h, 2 * w)


def _haar_inverse_quadrant(x, beta, alpha):
    b, c, h, w = x.shape
    c4 = c // 4
    hw = h * w
    x_r = x.reshape(b, 4, c4, hw)                       # free: flat, lane-dense spatial axis

    st = _pick_spatial_tile(c4, hw, x.dtype.itemsize, _BLOCK_BYTES_TARGET)
    if b * (hw // st) < 2 and st % 256 == 0:
        st //= 2

    kernel = functools.partial(_haar_quadrant_kernel, alpha=float(alpha), beta=float(beta))
    y = pl.pallas_call(
        kernel,
        out_shape=jax.ShapeDtypeStruct((b, 2, 2, c4, hw), x.dtype),
        grid=(b, hw // st),
        in_specs=[
            pl.BlockSpec((1, 4, c4, st), lambda bi, si: (bi, 0, 0, si)),
        ],
        out_specs=pl.BlockSpec((1, 2, 2, c4, st), lambda bi, si: (bi, 0, 0, 0, si)),
        compiler_params=pltpu.CompilerParams(
            dimension_semantics=("parallel", "parallel"),
            vmem_limit_bytes=_VMEM_LIMIT_BYTES,
        ),
    )(x_r)
    # y[b, r, s, co, i*W + j] -> out[b, co, 2i + r, 2j + s]  (single XLA transpose)
    out = y.reshape(b, 2, 2, c4, h, w).transpose(0, 3, 4, 1, 5, 2)
    return out.reshape(b, c4, 2 * h, 2 * w)


def haar_inverse(x: jax.Array, beta: float = 2.0, alpha: float = 0.5,
                 mode: str = "auto") -> jax.Array:
    """Pallas TPU implementation of HaarInverse.forward.

    x: [B, C, H, W] with C % 4 == 0  ->  [B, C // 4, 2H, 2W]
    mode: "fused"    -- pixel interleave done inside the kernel (no XLA transpose)
          "quadrant" -- lane-dense quadrant kernel + one XLA transpose
          "auto"     -- try fused, fall back to quadrant if it fails to lower
    (Call eagerly; the "auto" fallback catches compile-time lowering errors.)
    """
    assert x.ndim == 4 and x.shape[1] % 4 == 0, "The number of channels must be divisible by 4."
    if mode == "quadrant":
        return _haar_inverse_quadrant(x, beta, alpha)
    if mode == "fused":
        return _haar_inverse_fused(x, beta, alpha)
    try:
        return _haar_inverse_fused(x, beta, alpha)
    except Exception:
        # TODO(synk): the fused lane interleave relies on Mosaic lowering a
        # minor-dim stack+reshape; if this Mosaic version rejects it, use the
        # quadrant-layout kernel + one XLA transpose instead.
        return _haar_inverse_quadrant(x, beta, alpha)


# --------------------------------------------------------------------------- #
# Reference + self-test
# --------------------------------------------------------------------------- #
def _haar_inverse_ref(x: jax.Array, beta: float = 2.0, alpha: float = 0.5) -> jax.Array:
    """Pure-JAX mirror of the PyTorch module (for verification)."""
    b, c, h, w = x.shape
    c4 = c // 4
    f = lambda i: x[:, c4 * i: c4 * (i + 1)]
    out = jnp.zeros((b, c4, 2 * h, 2 * w), dtype=x.dtype)
    out = out.at[:, :, 0::2, 0::2].set(alpha * (f(0) * beta + f(1) + f(2) + f(3)))
    out = out.at[:, :, 0::2, 1::2].set(alpha * (f(0) * beta + f(1) - f(2) - f(3)))
    out = out.at[:, :, 1::2, 0::2].set(alpha * (f(0) * beta - f(1) + f(2) - f(3)))
    out = out.at[:, :, 1::2, 1::2].set(alpha * (f(0) * beta - f(1) - f(2) + f(3)))
    return out


if __name__ == "__main__":
    key = jax.random.PRNGKey(0)
    # HaarInverse has no learned parameters; beta=2 (magnitude preserving), alpha=0.5.
    B, C, H, W = 2, 4, 16, 16
    x = jax.random.normal(key, (B, C, H, W), dtype=jnp.float32)

    ref = _haar_inverse_ref(x, beta=2.0, alpha=0.5)

    out = jax.block_until_ready(haar_inverse(x, beta=2.0, alpha=0.5))                    # auto
    out_q = jax.block_until_ready(haar_inverse(x, beta=2.0, alpha=0.5, mode="quadrant"))  # fallback

    assert out.shape == (B, C // 4, 2 * H, 2 * W), out.shape
    assert jnp.allclose(out, ref, atol=1e-5, rtol=1e-5), "auto path mismatch vs reference"
    assert jnp.allclose(out_q, ref, atol=1e-5, rtol=1e-5), "quadrant path mismatch vs reference"

    print("KERNEL_OK")
</pallas_src>

<mosaic_0001>
module attributes {stable_mosaic.version = 11 : i64} {
  func.func @_haar_fused_kernel(%arg0: i32, %arg1: i32, %arg2: i32, %arg3: memref<1x4x1x16x16xf32, #tpu.memory_space<vmem>>, %arg4: memref<1x1x16x64xf32, #tpu.memory_space<vmem>>) attributes {dimension_semantics = [#tpu.dimension_semantics<parallel>, #tpu.dimension_semantics<parallel>, #tpu.dimension_semantics<parallel>], iteration_bounds = array<i64: 2, 1, 1>, scalar_prefetch = 0 : i64, scratch_operands = 0 : i64, tpu.core_type = #tpu.core_type<tc>, window_params = [{transform_indices = @transform_0, window_bounds = array<i64: 1, 4, 1, 16, 16>}, {transform_indices = @transform_1, window_bounds = array<i64: 1, 1, 16, 64>}]} {
    %c0 = arith.constant 0 : index
    %c0_0 = arith.constant 0 : index
    %c0_1 = arith.constant 0 : index
    %c0_2 = arith.constant 0 : index
    %c0_3 = arith.constant 0 : index
    %0 = vector.load %arg3[%c0, %c0_0, %c0_1, %c0_2, %c0_3] : memref<1x4x1x16x16xf32, #tpu.memory_space<vmem>>, vector<1x1x1x16x16xf32>
    %1 = vector.shape_cast %0 : vector<1x1x1x16x16xf32> to vector<1x16x16xf32>
    %cst = arith.constant 1.000000e+00 : f32
    %2 = vector.broadcast %cst : f32 to vector<1x16x16xf32>
    %3 = arith.mulf %1, %2 : vector<1x16x16xf32>
    %c0_4 = arith.constant 0 : index
    %c1 = arith.constant 1 : index
    %c0_5 = arith.constant 0 : index
    %c0_6 = arith.constant 0 : index
    %c0_7 = arith.constant 0 : index
    %4 = vector.load %arg3[%c0_4, %c1, %c0_5, %c0_6, %c0_7] : memref<1x4x1x16x16xf32, #tpu.memory_space<vmem>>, vector<1x1x1x16x16xf32>
    %5 = vector.shape_cast %4 : vector<1x1x1x16x16xf32> to vector<1x16x16xf32>
    %cst_8 = arith.constant 5.000000e-01 : f32
    %6 = vector.broadcast %cst_8 : f32 to vector<1x16x16xf32>
    %7 = arith.mulf %5, %6 : vector<1x16x16xf32>
    %c0_9 = arith.constant 0 : index
    %c2 = arith.constant 2 : index
    %c0_10 = arith.constant 0 : index
    %c0_11 = arith.constant 0 : index
    %c0_12 = arith.constant 0 : index
    %8 = vector.load %arg3[%c0_9, %c2, %c0_10, %c0_11, %c0_12] : memref<1x4x1x16x16xf32, #tpu.memory_space<vmem>>, vector<1x1x1x16x16xf32>
    %9 = vector.shape_cast %8 : vector<1x1x1x16x16xf32> to vector<1x16x16xf32>
    %cst_13 = arith.constant 5.000000e-01 : f32
    %10 = vector.broadcast %cst_13 : f32 to vector<1x16x16xf32>
    %11 = arith.mulf %9, %10 : vector<1x16x16xf32>
    %c0_14 = arith.constant 0 : index
    %c3 = arith.constant 3 : index
    %c0_15 = arith.constant 0 : index
    %c0_16 = arith.constant 0 : index
    %c0_17 = arith.constant 0 : index
    %12 = vector.load %arg3[%c0_14, %c3, %c0_15, %c0_16, %c0_17] : memref<1x4x1x16x16xf32, #tpu.memory_space<vmem>>, vector<1x1x1x16x16xf32>
    %13 = vector.shape_cast %12 : vector<1x1x1x16x16xf32> to vector<1x16x16xf32>
    %cst_18 = arith.constant 5.000000e-01 : f32
    %14 = vector.broadcast %cst_18 : f32 to vector<1x16x16xf32>
    %15 = arith.mulf %13, %14 : vector<1x16x16xf32>
    %16 = arith.addf %3, %7 : vector<1x16x16xf32>
    %17 = arith.subf %3, %7 : vector<1x16x16xf32>
    %18 = arith.addf %11, %15 : vector<1x16x16xf32>
    %19 = arith.subf %11, %15 : vector<1x16x16xf32>
    %20 = arith.addf %16, %18 : vector<1x16x16xf32>
    %21 = arith.subf %16, %18 : vector<1x16x16xf32>
    %22 = arith.addf %17, %19 : vector<1x16x16xf32>
    %23 = arith.subf %17, %19 : vector<1x16x16xf32>
    %24 = vector.shape_cast %20 : vector<1x16x16xf32> to vector<1x16x16x1xf32>
    %25 = vector.shape_cast %21 : vector<1x16x16xf32> to vector<1x16x16x1xf32>
    %26 = tpu.concatenate %24, %25 in 3 : vector<1x16x16x1xf32>, vector<1x16x16x1xf32> -> vector<1x16x16x2xf32>
    %27 = vector.shape_cast %26 : vector<1x16x16x2xf32> to vector<1x16x32xf32>
    %28 = vector.shape_cast %22 : vector<1x16x16xf32> to vector<1x16x16x1xf32>
    %29 = vector.shape_cast %23 : vector<1x16x16xf32> to vector<1x16x16x1xf32>
    %30 = tpu.concatenate %28, %29 in 3 : vector<1x16x16x1xf32>, vector<1x16x16x1xf32> -> vector<1x16x16x2xf32>
    %31 = vector.shape_cast %30 : vector<1x16x16x2xf32> to vector<1x16x32xf32>
    %c0_19 = arith.constant 0 : index
    %c0_20 = arith.constant 0 : index
    %c0_21 = arith.constant 0 : index
    %c0_22 = arith.constant 0 : index
    %32 = vector.load %arg4[%c0_19, %c0_20, %c0_21, %c0_22] : memref<1x1x16x64xf32, #tpu.memory_space<vmem>>, vector<1x1x16x32xf32>
    %33 = vector.shape_cast %32 : vector<1x1x16x32xf32> to vector<1x16x32xf32>
    %34 = vector.shape_cast %27 : vector<1x16x32xf32> to vector<1x1x16x32xf32>
    tpu.vector_store %arg4[%c0_19, %c0_20, %c0_21, %c0_22], %34 {strides = array<i32>} : memref<1x1x16x64xf32, #tpu.memory_space<vmem>>, vector<1x1x16x32xf32>,
    %c0_23 = arith.constant 0 : index
    %c0_24 = arith.constant 0 : index
    %c0_25 = arith.constant 0 : index
    %c32 = arith.constant 32 : index
    %35 = vector.load %arg4[%c0_23, %c0_24, %c0_25, %c32] : memref<1x1x16x64xf32, #tpu.memory_space<vmem>>, vector<1x1x16x32xf32>
    %36 = vector.shape_cast %35 : vector<1x1x16x32xf32> to vector<1x16x32xf32>
    %37 = vector.shape_cast %31 : vector<1x16x32xf32> to vector<1x1x16x32xf32>
    tpu.vector_store %arg4[%c0_23, %c0_24, %c0_25, %c32], %37 {strides = array<i32>} : memref<1x1x16x64xf32, #tpu.memory_space<vmem>>, vector<1x1x16x32xf32>,
    return
  }
  func.func @transform_0(%arg0: i32, %arg1: i32, %arg2: i32) -> (i32, i32, i32, i32, i32) {
    %c0_i32 = arith.constant 0 : i32
    %c0_i32_0 = arith.constant 0 : i32
    %c0_i32_1 = arith.constant 0 : i32
    return %arg0, %c0_i32, %arg1, %arg2, %c0_i32_0 : i32, i32, i32, i32, i32
  }
  func.func @transform_1(%arg0: i32, %arg1: i32, %arg2: i32) -> (i32, i32, i32, i32) {
    %c0_i32 = arith.constant 0 : i32
    %c0_i32_0 = arith.constant 0 : i32
    return %arg0, %arg1, %arg2, %c0_i32 : i32, i32, i32, i32
  }
}

module attributes {stable_mosaic.version = 11 : i64} {
  func.func @_haar_quadrant_kernel(%arg0: i32, %arg1: i32, %arg2: memref<1x4x1x256xf32, #tpu.memory_space<vmem>>, %arg3: memref<1x2x2x1x256xf32, #tpu.memory_space<vmem>>) attributes {dimension_semantics = [#tpu.dimension_semantics<parallel>, #tpu.dimension_semantics<parallel>], iteration_bounds = array<i64: 2, 1>, scalar_prefetch = 0 : i64, scratch_operands = 0 : i64, tpu.core_type = #tpu.core_type<tc>, window_params = [{transform_indices = @transform_0, window_bounds = array<i64: 1, 4, 1, 256>}, {transform_indices = @transform_1, window_bounds = array<i64: 1, 2, 2, 1, 256>}]} {
    %c0 = arith.constant 0 : index
    %c0_0 = arith.constant 0 : index
    %c0_1 = arith.constant 0 : index
    %c0_2 = arith.constant 0 : index
    %0 = vector.load %arg2[%c0, %c0_0, %c0_1, %c0_2] : memref<1x4x1x256xf32, #tpu.memory_space<vmem>>, vector<1x1x1x256xf32>
    %1 = vector.shape_cast %0 : vector<1x1x1x256xf32> to vector<1x256xf32>
    %cst = arith.constant 1.000000e+00 : f32
    %2 = vector.broadcast %cst : f32 to vector<1x256xf32>
    %3 = arith.mulf %1, %2 : vector<1x256xf32>
    %c0_3 = arith.constant 0 : index
    %c1 = arith.constant 1 : index
    %c0_4 = arith.constant 0 : index
    %c0_5 = arith.constant 0 : index
    %4 = vector.load %arg2[%c0_3, %c1, %c0_4, %c0_5] : memref<1x4x1x256xf32, #tpu.memory_space<vmem>>, vector<1x1x1x256xf32>
    %5 = vector.shape_cast %4 : vector<1x1x1x256xf32> to vector<1x256xf32>
    %cst_6 = arith.constant 5.000000e-01 : f32
    %6 = vector.broadcast %cst_6 : f32 to vector<1x256xf32>
    %7 = arith.mulf %5, %6 : vector<1x256xf32>
    %c0_7 = arith.constant 0 : index
    %c2 = arith.constant 2 : index
    %c0_8 = arith.constant 0 : index
    %c0_9 = arith.constant 0 : index
    %8 = vector.load %arg2[%c0_7, %c2, %c0_8, %c0_9] : memref<1x4x1x256xf32, #tpu.memory_space<vmem>>, vector<1x1x1x256xf32>
    %9 = vector.shape_cast %8 : vector<1x1x1x256xf32> to vector<1x256xf32>
    %cst_10 = arith.constant 5.000000e-01 : f32
    %10 = vector.broadcast %cst_10 : f32 to vector<1x256xf32>
    %11 = arith.mulf %9, %10 : vector<1x256xf32>
    %c0_11 = arith.constant 0 : index
    %c3 = arith.constant 3 : index
    %c0_12 = arith.constant 0 : index
    %c0_13 = arith.constant 0 : index
    %12 = vector.load %arg2[%c0_11, %c3, %c0_12, %c0_13] : memref<1x4x1x256xf32, #tpu.memory_space<vmem>>, vector<1x1x1x256xf32>
    %13 = vector.shape_cast %12 : vector<1x1x1x256xf32> to vector<1x256xf32>
    %cst_14 = arith.constant 5.000000e-01 : f32
    %14 = vector.broadcast %cst_14 : f32 to vector<1x256xf32>
    %15 = arith.mulf %13, %14 : vector<1x256xf32>
    %16 = arith.addf %3, %7 : vector<1x256xf32>
    %17 = arith.subf %3, %7 : vector<1x256xf32>
    %18 = arith.addf %11, %15 : vector<1x256xf32>
    %19 = arith.subf %11, %15 : vector<1x256xf32>
    %20 = arith.addf %16, %18 : vector<1x256xf32>
    %21 = arith.subf %16, %18 : vector<1x256xf32>
    %22 = arith.addf %17, %19 : vector<1x256xf32>
    %23 = arith.subf %17, %19 : vector<1x256xf32>
    %c0_15 = arith.constant 0 : index
    %c0_16 = arith.constant 0 : index
    %c0_17 = arith.constant 0 : index
    %c0_18 = arith.constant 0 : index
    %c0_19 = arith.constant 0 : index
    %24 = vector.load %arg3[%c0_15, %c0_16, %c0_17, %c0_18, %c0_19] : memref<1x2x2x1x256xf32, #tpu.memory_space<vmem>>, vector<1x1x1x1x256xf32>
    %25 = vector.shape_cast %24 : vector<1x1x1x1x256xf32> to vector<1x256xf32>
    %26 = vector.shape_cast %20 : vector<1x256xf32> to vector<1x1x1x1x256xf32>
    tpu.vector_store %arg3[%c0_15, %c0_16, %c0_17, %c0_18, %c0_19], %26 {strides = array<i32>} : memref<1x2x2x1x256xf32, #tpu.memory_space<vmem>>, vector<1x1x1x1x256xf32>,
    %c0_20 = arith.constant 0 : index
    %c0_21 = arith.constant 0 : index
    %c1_22 = arith.constant 1 : index
    %c0_23 = arith.constant 0 : index
    %c0_24 = arith.constant 0 : index
    %27 = vector.load %arg3[%c0_20, %c0_21, %c1_22, %c0_23, %c0_24] : memref<1x2x2x1x256xf32, #tpu.memory_space<vmem>>, vector<1x1x1x1x256xf32>
    %28 = vector.shape_cast %27 : vector<1x1x1x1x256xf32> to vector<1x256xf32>
    %29 = vector.shape_cast %21 : vector<1x256xf32> to vector<1x1x1x1x256xf32>
    tpu.vector_store %arg3[%c0_20, %c0_21, %c1_22, %c0_23, %c0_24], %29 {strides = array<i32>} : memref<1x2x2x1x256xf32, #tpu.memory_space<vmem>>, vector<1x1x1x1x256xf32>,
    %c0_25 = arith.constant 0 : index
    %c1_26 = arith.constant 1 : index
    %c0_27 = arith.constant 0 : index
    %c0_28 = arith.constant 0 : index
    %c0_29 = arith.constant 0 : index
    %30 = vector.load %arg3[%c0_25, %c1_26, %c0_27, %c0_28, %c0_29] : memref<1x2x2x1x256xf32, #tpu.memory_space<vmem>>, vector<1x1x1x1x256xf32>
    %31 = vector.shape_cast %30 : vector<1x1x1x1x256xf32> to vector<1x256xf32>
    %32 = vector.shape_cast %22 : vector<1x256xf32> to vector<1x1x1x1x256xf32>
    tpu.vector_store %arg3[%c0_25, %c1_26, %c0_27, %c0_28, %c0_29], %32 {strides = array<i32>} : memref<1x2x2x1x256xf32, #tpu.memory_space<vmem>>, vector<1x1x1x1x256xf32>,
    %c0_30 = arith.constant 0 : index
    %c1_31 = arith.constant 1 : index
    %c1_32 = arith.constant 1 : index
    %c0_33 = arith.constant 0 : index
    %c0_34 = arith.constant 0 : index
    %33 = vector.load %arg3[%c0_30, %c1_31, %c1_32, %c0_33, %c0_34] : memref<1x2x2x1x256xf32, #tpu.memory_space<vmem>>, vector<1x1x1x1x256xf32>
    %34 = vector.shape_cast %33 : vector<1x1x1x1x256xf32> to vector<1x256xf32>
    %35 = vector.shape_cast %23 : vector<1x256xf32> to vector<1x1x1x1x256xf32>
    tpu.vector_store %arg3[%c0_30, %c1_31, %c1_32, %c0_33, %c0_34], %35 {strides = array<i32>} : memref<1x2x2x1x256xf32, #tpu.memory_space<vmem>>, vector<1x1x1x1x256xf32>,
    return
  }
  func.func @transform_0(%arg0: i32, %arg1: i32) -> (i32, i32, i32, i32) {
    %c0_i32 = arith.constant 0 : i32
    %c0_i32_0 = arith.constant 0 : i32
    %c0_i32_1 = arith.constant 0 : i32
    return %arg0, %c0_i32, %c0_i32_0, %arg1 : i32, i32, i32, i32
  }
  func.func @transform_1(%arg0: i32, %arg1: i32) -> (i32, i32, i32, i32, i32) {
    %c0_i32 = arith.constant 0 : i32
    %c0_i32_0 = arith.constant 0 : i32
    %c0_i32_1 = arith.constant 0 : i32
    %c0_i32_2 = arith.constant 0 : i32
    return %arg0, %c0_i32, %c0_i32_0, %c0_i32_1, %arg1 : i32, i32, i32, i32, i32
  }
}

</mosaic_0001>

<bundles_post_ra>
// kernel: tpu_custom_call.1
= control target key start
LH: loop header
LB: loop body
LE: loop exit
PB: predicated region body
PF: predicated region fallthrough
CT: control target
= control target key end

     0   :  { %6 = vsyncpa [#allocation3], 0  ;;  %s4185_s0 = inlined_call_operand.hbm [shape: f32[2,4,1,16,16], index: 0, kind: input, shape index: {}]   ;;  %s4186_s1 = inlined_call_operand.hbm [shape: f32[2,1,16,64], index: 1, kind: output, shape index: {}]  }
   0x1   :  { %8 = vsyncpa [#allocation3 + $0x1], 0 }
   0x2   :  { %9 = vsyncpa [#allocation4], 0 }
   0x3   :  { %11 = vsyncpa [#allocation4 + $0x1], 0  ;;  %s2746_s6 = smov 0   ;;  %s2748_s7 = smov 0  }
   0x4   :  { %s2750_s8 = smov 0   ;;  %s2752_s9 = smov 0  }
   0x5   :  { %s2754_s10 = smov 0   ;;  %s2756_s11 = smov 0  }
   0x6 LB: > { %s2440_s12 = sadd.s32 4294967295, %s2713_s11   ;;  %s2441_s13 = sadd.s32 4294967294, %s2713_s11   ;;  %s2713_s11 = sphi %s2756_s11, %s17_s11   ;;  %s2709_s10 = sphi %s2754_s10, %s4255_s10   ;;  %s2705_s9 = sphi %s2752_s9, %s4254_s9   ;;  %s2701_s8 = sphi %s2750_s8, %s4253_s8   ;;  %s2697_s7 = sphi %s2748_s7, %s4252_s7   ;;  %s2693_s6 = sphi %s2746_s6, %s4251_s6  }
   0x7   : > { %s36_s14 = sadd.s32 1, %s2709_s10  ;;  %s47_s15 = sadd.s32 1, %s2701_s8 }
   0x8   : > { %p38_p0 = scmp.ge.s32.totalorder %s36_s14, 2  ;;  %p54_p1 = scmp.ne.s32.totalorder %s2701_s8, %s2697_s7 }
   0x9   : > { %p55_p2 = scmp.eq.s32.totalorder %s2713_s11, 0  ;;  %p60_p3 = scmp.ne.s32.totalorder %s2697_s7, %s2693_s6 }
   0xa   : > { %s4257_s14 = smov (%p38_p0, %s36_s14), 0  ;;  %p61_p5 = scmp.eq.s32.totalorder %s2440_s12, 0 }
   0xb   : > { %p2787_p4 = por %p55_p2, %p54_p1  ;;  %s40_s17 = ssub.s32 %s2709_s10, %s4257_s14 }
   0xc   : > { %p88_p6 = scmp.eq.s32.totalorder %s2440_s12, 1  ;;  %p45_p7 = scmp.eq.s32.totalorder %s40_s17, 0 }
   0xd   : > { %p2793_p8 = por %p61_p5, %p60_p3  ;;  %p94_p10 = scmp.eq.s32.totalorder %s2441_s13, 1 }
   0xe   : > { %p2797_p9 = por %p88_p6, %p54_p1  ;;  %p2443_p12 = scmp.ge.s32.totalorder %s2713_s11, 2 }
   0xf   : > { %s2802_s20 = scalar_select %p45_p7, %s2701_s8, %s47_s15  }
  0x10   : > { %p2804_p11 = por %p94_p10, %p60_p3  ;;  %p2475_p13 = scmp.lt.s32.totalorder %s2713_s11, 2 }
  0x11   : > { %s114_s22 = sand.u32 1, %s2701_s8   ;;  %s2461_s24 = sshll.u32 %s2709_s10, 6 }
  0x12   : > { %s2444_s23 = sshll.u32 %s114_s22, 6  ;;  %s127_s27 = scalar_lea.hbm %s4185_s0, %s2461_s24 }
  0x13   : > { %s118_s28 = scalar_lea.vmem [#allocation2], %s2444_s23  ;;  %s128_s30 = sshll.u32 %s127_s27, 4  ;;  %s129_s30 = int_to_ptr.hbm [resolvable:$true] %s128_s30 }
  0x14   : > { %s130_s29 = sshll.u32 %s118_s28, 4  ;;  %p2468_p0 = pnand %p2475_p13, %p2787_p4  ;;  %s131_s29 = int_to_ptr.vmem [resolvable:$true] %s130_s29 }
  0x15   : > { %p2447_p1 = scmp.ge.s32.totalorder %s2713_s11, 1  ;;  %s115_s2 = scalar_lea.sflag [#allocation3], %s114_s22 }
  0x16   : > { %s2715_s3 = smov 128   ;;  %s2716_s4 = smov 8  }
  0x17   : > { %2470 = dma.hbm_to_vmem [thread:$0]  (!%p2468_p0), %s129_s30, 1024, %s131_s29, %s115_s2, %s2715_s3, %s2715_s3, %s2716_s4  }
  0x18   : > { %p138_p2 = scmp.lt.s32.totalorder %s2713_s11, 3 }
  0x1a   : > { %p139_p3 = pnand %p2447_p1, %p138_p2 }
  0x1c   : > { %142 = sbr.rel (%p139_p3) target bundleno = 1091 (0x443), region = 24 }
  0x21   : > { %s2820_s5 = sand.u32 1, %s2697_s7  }
  0x22   : > { %s2448_s12 = sshll.u32 %s2820_s5, 6  ;;  %s145_s13 = scalar_lea.sflag [#allocation3], %s2820_s5 }
  0x23   : > { %s148_s15 = scalar_lea.vmem [#allocation2], %s2448_s12 }
  0x24   : > { %2684 = dma.done.wait (%p2793_p8), %s145_s13, 1024  }
  0x25   : > { %2686 = vsyncadd (%p2793_p8), %s145_s13, 4294966272  ;;  %v204_v0 = vlaneseq  ;;  %v170_v2 = vld [vmem:[%s148_s15] sm:$0xff]  ;;  %v2450_v3 = vld [vmem:[%s148_s15 + $0x10] sm:$0xff]  ;;  %vm619_vm0 = vcmask 7168   ;;  %vm1101_vm1 = vcmask 1047556   ;;  %s2719_s16 = smov 2  }
  0x26   : > { %v2452_v4 = vld [vmem:[%s148_s15 + $0x20] sm:$0xff]  ;;  %v175_v5 = vmul.f32 0.5, %v2450_v3  ;;  %v2454_v7 = vld [vmem:[%s148_s15 + $0x30] sm:$0xff]  ;;  %v2451_v15 = vld [vmem:[%s148_s15 + $0x18] sm:$0xff]  ;;  %s2720_s17 = smov 4   ;;  %s2721_s18 = smov 8  }
  0x27   : > { %v2828_v1 = vshrl.u32 %v204_v0, 7  ;;  %v180_v6 = vmul.f32 0.5, %v2452_v4  ;;  %v185_v8 = vmul.f32 0.5, %v2454_v7  ;;  %v2453_v16 = vld [vmem:[%s148_s15 + $0x28] sm:$0xff]  ;;  %v2455_v17 = vld [vmem:[%s148_s15 + $0x38] sm:$0xff]  ;;  %v176_v18 = vmul.f32 0.5, %v2451_v15 }
  0x28   : > { %v187_v9 = vadd.f32 %v175_v5, %v170_v2  ;;  %v181_v19 = vmul.f32 0.5, %v2453_v16  ;;  %v186_v20 = vmul.f32 0.5, %v2455_v17  ;;  %v171_v21 = vld [vmem:[%s148_s15 + $0x8] sm:$0xff]  ;;  %v189_v36 = vsub.f32 %v170_v2, %v175_v5  ;;  %s2722_s22 = smov 10   ;;  %s2723_s23 = smov 14  }
  0x29   : > { %2549 = vset.pattern.permute.xlu2 %v2828_v1  ;;  %2547 = vset.pattern.permute.xlu1 %v2828_v1  ;;  %v191_v10 = vadd.f32 %v185_v8, %v180_v6  ;;  %v2841_v22 = vadd.s32 8, %v2828_v1  ;;  %v188_v24 = vadd.f32 %v176_v18, %v171_v21  ;;  %v193_v38 = vsub.f32 %v180_v6, %v185_v8  ;;  %s2724_s24 = smov 16   ;;  %s2725_s25 = smov 20  }
  0x2a   : > { %2546 = vset.pattern.permute.xlu0 %v2828_v1  ;;  %v192_v25 = vadd.f32 %v186_v20, %v181_v19  ;;  %v190_v43 = vsub.f32 %v171_v21, %v176_v18  ;;  %v194_v44 = vsub.f32 %v181_v19, %v186_v20  ;;  %s2726_s26 = smov 22   ;;  %s2727_s27 = smov 26   ;;  %vm1669_vm2 = vcmask 15360  }
  0x2b   : > { %v2833_v11 = vadd.f32 %v191_v10, %v187_v9  ;;  %v2854_v30 = vsub.f32 %v187_v9, %v191_v10  ;;  %v2871_v39 = vadd.f32 %v193_v38, %v189_v36  ;;  %v2888_v48 = vsub.f32 %v189_v36, %v193_v38  ;;  %s2728_s28 = smov 28   ;;  %s2729_s29 = smov 6  }
  0x2c   : > { %v2846_v26 = vadd.f32 %v192_v25, %v188_v24  ;;  %v2860_v32 = vsub.f32 %v188_v24, %v192_v25  ;;  %v2882_v45 = vadd.f32 %v194_v44, %v190_v43  ;;  %v2899_v52 = vsub.f32 %v190_v43, %v194_v44  ;;  %s2730_s30 = smov 12   ;;  %s2731_s2 = smov 18  }
  0x2d   : > { %v229_v12 = vperm.slane %v2833_v11, 2  ;;  %v216_v13 = vperm.slane %v2833_v11, 1  ;;  %v203_v14 = vperm.slane %v2833_v11, 0  ;;  %v255_v23 = vperm.slane %v2833_v11, 4  ;;  %s2732_s3 = smov 24   ;;  %s2733_s4 = smov 30  }
  0x2e   : > { %v320_v27 = vperm.slane %v2846_v26, 1  ;;  %v242_v28 = vperm.slane %v2833_v11, 3  ;;  %v385_v29 = vperm.slane %v2846_v26, 6  ;;  %v450_v31 = vperm.slane %v2854_v30, 3  ;;  %4205 = vst [vmem:[#allocation8_spill] sm:$0xff] %v2899_v52  ;;  %s2449_s12 = sshll.u32 %s2820_s5, 4 }
  0x2f   : > { %v268_v33 = vperm.slane %v2833_v11, 5  ;;  %v515_v34 = vperm.slane %v2860_v32, 0  ;;  %v281_v35 = vperm.slane %v2833_v11, 6  ;;  %v580_v37 = vperm.slane %v2860_v32, 5  ;;  %s4098_s13 = scalar_lea.vmem [#allocation5], %s2449_s12  ;;  %s2734_s15 = smov 32  }
  0x30   : > { %v4193_v40 = vperm.slane %v2871_v39, 2  ;;  %v294_v41 = vperm.slane %v2833_v11, 7  ;;  %v4191_v42 = vperm.slane %v2871_v39, 7  ;;  %v307_v46 = vperm.slane %v2846_v26, 0 }
  0x31   : > { %234 = vperm.xlu2 %2549, %v229_v12   ;;  %221 = vperm.xlu1 %2547, %v216_v13   ;;  %v4190_v47 = vperm.slane %v2882_v45, 4  ;;  %v4189_v49 = vperm.slane %v2888_v48, 1  ;;  %v333_v50 = vperm.slane %v2846_v26, 2  ;;  %v4188_v51 = vperm.slane %v2888_v48, 6 }
  0x32   : > { %208 = vperm.xlu0 %2546, %v203_v14   ;;  %v346_v53 = vperm.slane %v2846_v26, 3  ;;  %v4187_v54 = vperm.slane %v2899_v52, 3  ;;  %v359_v55 = vperm.slane %v2846_v26, 4  ;;  %v372_v56 = vperm.slane %v2846_v26, 5 }
  0x33   : > { %v398_v57 = vperm.slane %v2846_v26, 7  ;;  %v411_v60 = vperm.slane %v2854_v30, 0  ;;  %v476_v61 = vperm.slane %v2854_v30, 5  ;;  %v541_v0 = vperm.slane %v2860_v32, 2 }
  0x34   : > { %v424_v4 = vperm.slane %v2854_v30, 1  ;;  %v606_v5 = vperm.slane %v2860_v32, 7  ;;  %v437_v8 = vperm.slane %v2854_v30, 2  ;;  %v489_v24 = vperm.slane %v2854_v30, 6 }
  0x35   : > { %v528_v36 = vperm.slane %v2860_v32, 1  ;;  %vm1672_vm3 = vcmask 31744   ;;  %vm1675_vm4 = vcmask 48128   ;;  %vm1678_vm5 = vcmask 64512  }
  0x36   : > { %vm1681_vm6 = vcmask 80896   ;;  %vm1684_vm7 = vcmask 97280   ;;  %vm1687_vm8 = vcmask 113664   ;;  %vm1690_vm9 = vcmask 130048  }
  0x37   : > { %vm1693_vm10 = vcmask 146432   ;;  %vm1696_vm11 = vcmask 162816   ;;  %vm1699_vm12 = vcmask 179200   ;;  %vm1702_vm13 = vcmask 195584  }
  0x38   : > { %vm1705_vm14 = vcmask 211968   ;;  %vm1711_vm15 = vcmask 244736  }
  0x39   : > { %2550 = vset.pattern.permute.xlu2 %v2841_v22  ;;  %2548 = vset.pattern.permute.xlu1 %v2841_v22 }
  0x3a   : > { %260 = vperm.xlu0 %2546, %v255_v23  }
  0x41   : > { %240 = vperm.xlu2 %2550, %v229_v12   ;;  %227 = vperm.xlu1 %2548, %v216_v13   ;;  %v463_v13 = vperm.slane %v2854_v30, 4 }
  0x42   : > { %325 = vperm.xlu0 %2546, %v320_v27  }
  0x49   : > { %253 = vperm.xlu2 %2550, %v242_v28   ;;  %2551 = vset.pattern.permute.xlu1 %v2828_v1 }
  0x4a   : > { %390 = vperm.xlu0 %2546, %v385_v29  }
  0x51   : > { %2553 = vset.pattern.permute.xlu2 %v2828_v1  ;;  %247 = vperm.xlu1 %2551, %v242_v28   ;;  %v502_v28 = vperm.slane %v2854_v30, 7 }
  0x52   : > { %455 = vperm.xlu0 %2546, %v450_v31  }
  0x59   : > { %273 = vperm.xlu2 %2553, %v268_v33   ;;  %2552 = vset.pattern.permute.xlu1 %v2841_v22 }
  0x5a   : > { %520 = vperm.xlu0 %2546, %v515_v34  }
  0x61   : > { %286 = vperm.xlu2 %2553, %v281_v35   ;;  %266 = vperm.xlu1 %2552, %v255_v23  }
  0x62   : > { %585 = vperm.xlu0 %2546, %v580_v37  }
  0x69   : > { %2555 = vset.pattern.permute.xlu2 %v2841_v22  ;;  %279 = vperm.xlu1 %2552, %v268_v33  }
  0x6a   : > { %683 = vperm.xlu0 %2546, %v4193_v40  }
  0x71   : > { %305 = vperm.xlu2 %2555, %v294_v41   ;;  %2554 = vset.pattern.permute.xlu1 %v2828_v1 }
  0x72   : > { %748 = vperm.xlu0 %2546, %v4191_v42  }
  0x79   : > { %318 = vperm.xlu2 %2555, %v307_v46   ;;  %299 = vperm.xlu1 %2554, %v294_v41  }
  0x7a   : > { %813 = vperm.xlu0 %2546, %v4190_v47  }
  0x81   : > { %2557 = vset.pattern.permute.xlu2 %v2828_v1  ;;  %312 = vperm.xlu1 %2554, %v307_v46  }
  0x82   : > { %878 = vperm.xlu0 %2546, %v4189_v49   ;;  %v2717_v49 = vmov 1983009808  }
  0x83   : > { %v1106_v47 = vunpack.c.l.s4 %v2717_v49 }
  0x89   : > { %338 = vperm.xlu2 %2557, %v333_v50   ;;  %2556 = vset.pattern.permute.xlu1 %v2841_v22 }
  0x8a   : > { %943 = vperm.xlu0 %2546, %v4188_v51  }
  0x8b   : > { %v2914_v58 = vpop.permute.xlu2 %234 }
  0x91   : > { %351 = vperm.xlu2 %2557, %v346_v53   ;;  %331 = vperm.xlu1 %2556, %v320_v27  }
  0x92   : > { %1008 = vperm.xlu0 %2546, %v4187_v54  }
  0x99   : > { %2559 = vset.pattern.permute.xlu2 %v2841_v22  ;;  %344 = vperm.xlu1 %2556, %v333_v50  }
  0x9a   : > { %2596 = vset.pattern.permute.xlu0 %v2841_v22 }
  0x9b   : > { %v2921_v62 = vpop.permute.xlu2 %240 }
  0xa1   : > { %370 = vperm.xlu2 %2559, %v359_v55   ;;  %2558 = vset.pattern.permute.xlu1 %v2828_v1 }
  0xa2   : > { %214 = vperm.xlu0 %2596, %v203_v14  }
  0xa3   : > { %v2929_v2 = vpop.permute.xlu2 %253  ;;  %v2943_v9 = vpop.permute.xlu1 %221 }
  0xa4   : > { %v2916_v59 = vpop.permute.xlu0 %208 }
  0xa9   : > { %383 = vperm.xlu2 %2559, %v372_v56   ;;  %364 = vperm.xlu1 %2558, %v359_v55   ;;  %v554_v55 = vperm.slane %v2860_v32, 3 }
  0xaa   : > { %292 = vperm.xlu0 %2596, %v281_v35  }
  0xac   : > { %v2923_v63 = vpop.permute.xlu0 %260 }
  0xb1   : > { %2561 = vset.pattern.permute.xlu2 %v2828_v1  ;;  %377 = vperm.xlu1 %2558, %v372_v56  }
  0xb2   : > { %357 = vperm.xlu0 %2596, %v346_v53  }
  0xb3   : > { %v2938_v6 = vpop.permute.xlu2 %273  ;;  %v2949_v12 = vpop.permute.xlu1 %227 }
  0xb4   : > { %v2931_v3 = vpop.permute.xlu0 %325 }
  0xb9   : > { %403 = vperm.xlu2 %2561, %v398_v57   ;;  %2560 = vset.pattern.permute.xlu1 %v2841_v22 }
  0xba   : > { %422 = vperm.xlu0 %2596, %v411_v60  }
  0xbb   : > { %v2945_v10 = vpop.permute.xlu2 %286 }
  0xbc   : > { %v2940_v7 = vpop.permute.xlu0 %390 }
  0xc1   : > { %416 = vperm.xlu2 %2561, %v411_v60   ;;  %396 = vperm.xlu1 %2560, %v385_v29  }
  0xc2   : > { %487 = vperm.xlu0 %2596, %v476_v61  }
  0xc3   : > { %v2957_v16 = vpop.permute.xlu1 %247 }
  0xc4   : > { %v2947_v11 = vpop.permute.xlu0 %455 }
  0xc5   : > { %v3044_v51 = vsel %vm619_vm0, %v2957_v16, %v2947_v11  ;;  %v3064_v16 = vunpack.c.0.s8 %v1106_v47 }
  0xc9   : > { %2563 = vset.pattern.permute.xlu2 %v2841_v22  ;;  %409 = vperm.xlu1 %2560, %v398_v57  }
  0xca   : > { %552 = vperm.xlu0 %2596, %v541_v0  }
  0xcb   : > { %v2955_v15 = vpop.permute.xlu2 %305 }
  0xcc   : > { %v2953_v14 = vpop.permute.xlu0 %520 }
  0xd1   : > { %435 = vperm.xlu2 %2563, %v424_v4   ;;  %2562 = vset.pattern.permute.xlu1 %v2828_v1 }
  0xd2   : > { %617 = vperm.xlu0 %2596, %v606_v5  }
  0xd3   : > { %v2962_v18 = vpop.permute.xlu1 %266  ;;  %v2966_v19 = vpop.permute.xlu2 %318 }
  0xd4   : > { %v2960_v17 = vpop.permute.xlu0 %585 }
  0xd9   : > { %448 = vperm.xlu2 %2563, %v437_v8   ;;  %429 = vperm.xlu1 %2562, %v424_v4  }
  0xdb   : > { %v2971_v21 = vpop.permute.xlu1 %279 }
  0xdc   : > { %v2969_v20 = vpop.permute.xlu0 %683 }
  0xdd   : > { %4206 = vst [vmem:[#allocation9_spill] sm:$0xff] %v2969_v20 }
  0xe1   : > { %2565 = vset.pattern.permute.xlu2 %v2828_v1  ;;  %442 = vperm.xlu1 %2562, %v437_v8  }
  0xe3   : > { %v2973_v23 = vpop.permute.xlu2 %338 }
  0xe4   : > { %v2979_v26 = vpop.permute.xlu0 %748 }
  0xe5   : > { %4207 = vst [vmem:[#allocation10_spill] sm:$0xff] %v2979_v26 }
  0xe9   : > { %468 = vperm.xlu2 %2565, %v463_v13   ;;  %2564 = vset.pattern.permute.xlu1 %v2841_v22 }
  0xeb   : > { %v2977_v25 = vpop.permute.xlu1 %299  ;;  %v2981_v27 = vpop.permute.xlu2 %351 }
  0xf1   : > { %481 = vperm.xlu2 %2565, %v476_v61   ;;  %461 = vperm.xlu1 %2564, %v450_v31   ;;  %v2986_v31 = vpop.permute.xlu0 %813 }
  0xf2   : > { %4208 = vst [vmem:[#allocation11_spill] sm:$0xff] %v2986_v31 }
  0xf3   : > { %v2984_v29 = vpop.permute.xlu1 %312 }
  0xf9   : > { %2567 = vset.pattern.permute.xlu2 %v2841_v22  ;;  %474 = vperm.xlu1 %2564, %v463_v13   ;;  %v2994_v38 = vpop.permute.xlu0 %878 }
  0xfa   : > { %4209 = vst [vmem:[#allocation12_spill] sm:$0xff] %v2994_v38 }
  0xfb   : > { %v2988_v33 = vpop.permute.xlu2 %370 }
 0x101   : > { %500 = vperm.xlu2 %2567, %v489_v24   ;;  %2566 = vset.pattern.permute.xlu1 %v2828_v1  ;;  %v3003_v43 = vpop.permute.xlu0 %943 }
 0x102   : > { %4210 = vst [vmem:[#allocation13_spill] sm:$0xff] %v3003_v43 }
 0x103   : > { %v2991_v35 = vpop.permute.xlu1 %331  ;;  %v2996_v41 = vpop.permute.xlu2 %383 }
 0x109   : > { %513 = vperm.xlu2 %2567, %v502_v28   ;;  %494 = vperm.xlu1 %2566, %v489_v24   ;;  %v3010_v50 = vpop.permute.xlu0 %1008  ;;  %v593_v24 = vperm.slane %v2860_v32, 6 }
 0x10a   : > { %4211 = vst [vmem:[#allocation14_spill] sm:$0xff] %v3010_v50 }
 0x10b   : > { %v2999_v30 = vpop.permute.xlu1 %344 }
 0x111   : > { %2569 = vset.pattern.permute.xlu2 %v2828_v1  ;;  %507 = vperm.xlu1 %2566, %v502_v28   ;;  %v4192_v28 = vperm.slane %v2882_v45, 1 }
 0x113   : > { %v3005_v44 = vpop.permute.xlu2 %403 }
 0x114   : > { %v215_v57 = vpop.permute.xlu0 %214 }
 0x119   : > { %533 = vperm.xlu2 %2569, %v528_v36   ;;  %2568 = vset.pattern.permute.xlu1 %v2841_v22 }
 0x11b   : > { %v3007_v46 = vpop.permute.xlu1 %364  ;;  %v417_v53 = vpop.permute.xlu2 %416 }
 0x11c   : > { %v3022_v4 = vpop.permute.xlu0 %292  ;;  %v3062_v49 = vsel %vm619_vm0, %v2916_v59, %v417_v53 }
 0x121   : > { %546 = vperm.xlu2 %2569, %v541_v0   ;;  %526 = vperm.xlu1 %2568, %v515_v34   ;;  %v567_v34 = vperm.slane %v2860_v32, 4  ;;  %v4195_v0 = vperm.slane %v2871_v39, 4 }
 0x123   : > { %v3013_v56 = vpop.permute.xlu1 %377  ;;  %715 = vperm.xlu0 %2596, %v4195_v0  }
 0x129   : > { %2571 = vset.pattern.permute.xlu2 %v2841_v22  ;;  %539 = vperm.xlu1 %2568, %v528_v36  }
 0x12b   : > { %v436_v60 = vpop.permute.xlu2 %435  ;;  %780 = vperm.xlu0 %2596, %v4192_v28  }
 0x12c   : > { %v623_v0 = vsel %vm619_vm0, %v2949_v12, %v436_v60 }
 0x131   : > { %565 = vperm.xlu2 %2571, %v554_v55   ;;  %2570 = vset.pattern.permute.xlu1 %v2828_v1 }
 0x133   : > { %v3017_v61 = vpop.permute.xlu1 %396  ;;  %v449_v8 = vpop.permute.xlu2 %448 }
 0x139   : > { %578 = vperm.xlu2 %2571, %v567_v34   ;;  %559 = vperm.xlu1 %2570, %v554_v55   ;;  %v3032_v55 = vpop.permute.xlu0 %357 }
 0x13b   : > { %v3025_v13 = vpop.permute.xlu1 %409 }
 0x141   : > { %2573 = vset.pattern.permute.xlu2 %v2828_v1  ;;  %572 = vperm.xlu1 %2570, %v567_v34   ;;  %v4194_v34 = vperm.slane %v2882_v45, 6  ;;  %v423_v40 = vpop.permute.xlu0 %422 }
 0x143   : > { %v3029_v36 = vpop.permute.xlu2 %468  ;;  %845 = vperm.xlu0 %2596, %v4194_v34   ;;  %v4196_v34 = vperm.slane %v2888_v48, 3 }
 0x149   : > { %598 = vperm.xlu2 %2573, %v593_v24   ;;  %2572 = vset.pattern.permute.xlu1 %v2841_v22 }
 0x14b   : > { %v430_v54 = vpop.permute.xlu1 %429  ;;  %v3048_v42 = vpop.permute.xlu2 %481  ;;  %910 = vperm.xlu0 %2596, %v4196_v34  }
 0x151   : > { %611 = vperm.xlu2 %2573, %v606_v5   ;;  %591 = vperm.xlu1 %2572, %v580_v37   ;;  %v3052_v5 = vsel %vm619_vm0, %v2943_v9, %v430_v54  ;;  %v1113_v37 = vrot.slane %v3044_v51, 4 }
 0x153   : > { %v443_v28 = vpop.permute.xlu1 %442  ;;  %v1114_v54 = vsel %vm1101_vm1, %v1113_v37, %v3052_v5 }
 0x154   : > { %v3056_v32 = vsel %vm619_vm0, %v2914_v58, %v443_v28  ;;  %v621_v28 = vsel %vm619_vm0, %v215_v57, %v423_v40  ;;  %v3077_v59 = vperm.slane %v1114_v54, %v3064_v16  ;;  %v652_v40 = vperm.slane %v2871_v39, 0  ;;  %v488_v57 = vpop.permute.xlu0 %487 }
 0x155   : > { %v1100_v11 = vrot.slane %v3056_v32, 4  ;;  %v1327_v37 = vrot.slane %v621_v28, 4  ;;  %v4197_v54 = vperm.slane %v2899_v52, 0  ;;  %v631_v31 = vsel %vm619_vm0, %v2971_v21, %v488_v57 }
 0x156   : > { %v1363_v43 = vrot.slane %v631_v31, 4  ;;  %v665_v57 = vperm.slane %v2871_v39, 1 }
 0x157   : > { %v1102_v58 = vsel %vm1101_vm1, %v1100_v11, %v3062_v49  ;;  %v625_v11 = vsel %vm619_vm0, %v2921_v62, %v449_v8  ;;  %975 = vperm.xlu0 %2596, %v4197_v54   ;;  %v1339_v62 = vrot.slane %v623_v0, 4 }
 0x158   : > { %v3072_v9 = vperm.slane %v1102_v58, %v3064_v16  ;;  %v1328_v34 = vsel %vm1101_vm1, %v625_v11, %v1327_v37 }
 0x159   : > { %2575 = vset.pattern.permute.xlu2 %v2841_v22  ;;  %604 = vperm.xlu1 %2572, %v593_v24   ;;  %v1325_v24 = vrot.slane %v625_v11, 4 }
 0x15a   : > { %v1151_v47 = vrot.slane %v3072_v9, 4 }
 0x15b   : > { %v501_v53 = vpop.permute.xlu2 %500  ;;  %v1326_v8 = vsel %vm1101_vm1, %v1325_v24, %v621_v28  ;;  %v2718_v24 = vmov 1934713408  }
 0x15c   : > { %v3086_v58 = vsel %vm1101_vm1, %v3077_v59, %v1151_v47  ;;  %v1336_v47 = vperm.slane %v1328_v34, %v3064_v16  ;;  %v1332_v54 = vperm.slane %v1326_v8, %v3064_v16  ;;  %v633_v34 = vsel %vm619_vm0, %v3022_v4, %v501_v53 }
 0x15d   : > { %v1154_v20 = vunpack.c.l.s4 %v2718_v24 }
 0x15e   : > { %v1387_v38 = vrot.slane %v1336_v47, 4 }
 0x161   : > { %663 = vperm.xlu2 %2575, %v652_v40   ;;  %2574 = vset.pattern.permute.xlu1 %v2828_v1 }
 0x163   : > { %v514_v50 = vpop.permute.xlu2 %513  ;;  %v462_v26 = vpop.permute.xlu1 %461 }
 0x164   : > { %v635_v12 = vsel %vm619_vm0, %v2955_v15, %v514_v50  ;;  %v627_v21 = vsel %vm619_vm0, %v2929_v2, %v462_v26  ;;  %v4198_v26 = vperm.slane %v2899_v52, 5 }
 0x165   : > { %v1361_v60 = vrot.slane %v635_v12, 4  ;;  %v1337_v37 = vrot.slane %v627_v21, 4  ;;  %v1340_v11 = vsel %vm1101_vm1, %v627_v21, %v1339_v62  ;;  %v1364_v50 = vsel %vm1101_vm1, %v635_v12, %v1363_v43 }
 0x166   : > { %v1348_v28 = vperm.slane %v1340_v11, %v3064_v16  ;;  %v1349_v21 = vrot.slane %v633_v34, 4  ;;  %1040 = vperm.xlu0 %2596, %v4198_v26  }
 0x167   : > { %v1362_v15 = vsel %vm1101_vm1, %v1361_v60, %v631_v31  ;;  %v1338_v2 = vsel %vm1101_vm1, %v1337_v37, %v623_v0  ;;  %v1375_v31 = vrot.slane %v1332_v54, 4  ;;  %v1372_v0 = vperm.slane %v1364_v50, %v3064_v16 }
 0x168   : > { %v1344_v62 = vperm.slane %v1338_v2, %v3064_v16  ;;  %v1388_v4 = vsel %vm1101_vm1, %v1348_v28, %v1387_v38  ;;  %v1368_v53 = vperm.slane %v1362_v15, %v3064_v16  ;;  %v3120_v37 = vunpack.c.0.s8 %v1154_v20 }
 0x169   : > { %676 = vperm.xlu2 %2575, %v665_v57   ;;  %657 = vperm.xlu1 %2574, %v652_v40   ;;  %v1385_v43 = vrot.slane %v1348_v28, 4  ;;  %v1409_v50 = vrot.slane %v1372_v0, 4 }
 0x16a   : > { %v1373_v8 = vrot.slane %v1344_v62, 4  ;;  %v1376_v24 = vsel %vm1101_vm1, %v1344_v62, %v1375_v31  ;;  %v1397_v2 = vrot.slane %v1368_v53, 4 }
 0x16b   : > { %v475_v60 = vpop.permute.xlu1 %474  ;;  %v1386_v62 = vsel %vm1101_vm1, %v1385_v43, %v1336_v47 }
 0x16c   : > { %v629_v12 = vsel %vm619_vm0, %v2962_v18, %v475_v60  ;;  %v1374_v40 = vsel %vm1101_vm1, %v1373_v8, %v1332_v54  ;;  %v3133_v54 = vperm.slane %v1376_v24, %v3120_v37  ;;  %v3154_v43 = vperm.slane %v1386_v62, %v3120_v37 }
 0x16d   : > { %v1350_v38 = vsel %vm1101_vm1, %v1349_v21, %v629_v12  ;;  %v1351_v11 = vrot.slane %v629_v12, 4  ;;  %v1380_v15 = vperm.slane %v1374_v40, %v3120_v37  ;;  %v1396_v12 = vperm.slane %v1388_v4, %v3120_v37 }
 0x16e   : > { %v1356_v26 = vperm.slane %v1350_v38, %v3064_v16 }
 0x16f   : > { %v1352_v20 = vsel %vm1101_vm1, %v633_v34, %v1351_v11  ;;  %v1423_v8 = vrot.slane %v1380_v15, 4 }
 0x170   : > { %v1360_v28 = vperm.slane %v1352_v20, %v3064_v16  ;;  %v1398_v52 = vsel %vm1101_vm1, %v1397_v2, %v1356_v26  ;;  %v1399_v18 = vrot.slane %v1356_v26, 4  ;;  %v1115_v20 = vrot.slane %v3052_v5, 4 }
 0x171   : > { %2577 = vset.pattern.permute.xlu2 %v2828_v1  ;;  %670 = vperm.xlu1 %2574, %v665_v57   ;;  %v1404_v21 = vperm.slane %v1398_v52, %v3120_v37  ;;  %v1427_v52 = vrot.slane %v3133_v54, 4  ;;  %v1103_v5 = vrot.slane %v3062_v49, 4  ;;  %v630_v49 = vsel %vm619_vm0, %v2938_v6, %v3048_v42 }
 0x172   : > { %v1411_v31 = vrot.slane %v1360_v28, 4  ;;  %v1400_v60 = vsel %vm1101_vm1, %v1368_v53, %v1399_v18  ;;  %v1410_v34 = vsel %vm1101_vm1, %v1409_v50, %v1360_v28  ;;  %v691_v53 = vperm.slane %v2871_v39, 3 }
 0x173   : > { %v3142_v26 = vperm.slane %v1400_v60, %v3120_v37  ;;  %v3145_v40 = vperm.slane %v1410_v34, %v3120_v37  ;;  %v1421_v38 = vrot.slane %v1404_v21, 4  ;;  %v3148_v57 = vsel %vm1101_vm1, %v1404_v21, %v1423_v8 }
 0x174   : > { %v1412_v47 = vsel %vm1101_vm1, %v1372_v0, %v1411_v31  ;;  %v1435_v50 = vrot.slane %v1396_v12, 4  ;;  %v628_v0 = vsel %vm619_vm0, %v2923_v63, %v3029_v36  ;;  %v1116_v63 = vsel %vm1101_vm1, %v3044_v51, %v1115_v20 }
 0x175   : > { %v3157_v4 = vsel %vm1101_vm1, %v1421_v38, %v1380_v15  ;;  %v3161_v11 = vsel %vm1101_vm1, %v3142_v26, %v1427_v52  ;;  %v1429_v24 = vrot.slane %v3145_v40, 4  ;;  %v1420_v2 = vperm.slane %v1412_v47, %v3120_v37  ;;  %v3188_v38 = vpop.permute.xlu2 %533 }
 0x176   : > { %v1127_v21 = vrot.slane %v628_v0, 4  ;;  %v1104_v31 = vsel %vm1101_vm1, %v3056_v32, %v1103_v5  ;;  %v1124_v34 = vperm.slane %v1116_v63, %v3064_v16  ;;  %v4213_v32 = vperm.slane %v2871_v39, 2 }
 0x177   : > { %v3171_v28 = vsel %vm1101_vm1, %v1429_v24, %v3154_v43  ;;  %v1433_v15 = vrot.slane %v1420_v2, 4  ;;  %v3174_v18 = vsel %vm1101_vm1, %v1420_v2, %v1435_v50  ;;  %v1112_v51 = vperm.slane %v1104_v31, %v3064_v16 }
 0x178   : > { %v1161_v47 = vrot.slane %v1124_v34, 4  ;;  %v1139_v2 = vrot.slane %v630_v49, 4  ;;  %v1149_v20 = vrot.slane %v3077_v59, 4 }
 0x179   : > { %696 = vperm.xlu2 %2577, %v691_v53   ;;  %2576 = vset.pattern.permute.xlu1 %v2841_v22  ;;  %v3178_v62 = vsel %vm1101_vm1, %v1433_v15, %v1396_v12 }
 0x17a   : > { %v1162_v6 = vsel %vm1101_vm1, %v1161_v47, %v1112_v51 }
 0x17b   : > { %v495_v36 = vpop.permute.xlu1 %494  ;;  %v3212_v59 = vperm.slane %v1162_v6, %v3120_v37 }
 0x17c   : > { %v632_v8 = vsel %vm619_vm0, %v2945_v10, %v495_v36  ;;  %v4212_v10 = vperm.slane %v2871_v39, 4 }
 0x17d   : > { %v1125_v60 = vrot.slane %v632_v8, 4  ;;  %v1128_v12 = vsel %vm1101_vm1, %v632_v8, %v1127_v21  ;;  %v1150_v8 = vsel %vm1101_vm1, %v1149_v20, %v3072_v9 }
 0x17e   : > { %v1136_v24 = vperm.slane %v1128_v12, %v3064_v16  ;;  %v1156_v9 = vperm.slane %v1150_v8, %v3120_v37 }
 0x17f   : > { %v1126_v52 = vsel %vm1101_vm1, %v1125_v60, %v628_v0  ;;  %v1163_v0 = vrot.slane %v1112_v51, 4 }
 0x180   : > { %v1132_v15 = vperm.slane %v1126_v52, %v3064_v16  ;;  %v1187_v63 = vrot.slane %v1136_v24, 4 }
 0x181   : > { %709 = vperm.xlu2 %2577, %v4212_v10   ;;  %689 = vperm.xlu1 %2576, %v4213_v32   ;;  %v547_v10 = vpop.permute.xlu2 %546 }
 0x182   : > { %v1175_v60 = vrot.slane %v1132_v15, 4 }
 0x183   : > { %v508_v50 = vpop.permute.xlu1 %507 }
 0x184   : > { %v634_v42 = vsel %vm619_vm0, %v2977_v25, %v508_v50  ;;  %v1160_v25 = vperm.slane %v3086_v58, %v3120_v37 }
 0x185   : > { %v1137_v5 = vrot.slane %v634_v42, 4  ;;  %v1140_v21 = vsel %vm1101_vm1, %v634_v42, %v1139_v2 }
 0x186   : > { %v1148_v36 = vperm.slane %v1140_v21, %v3064_v16  ;;  %v717_v21 = vperm.slane %v2871_v39, 5 }
 0x187   : > { %v1138_v31 = vsel %vm1101_vm1, %v1137_v5, %v630_v49  ;;  %v1164_v49 = vsel %vm1101_vm1, %v1124_v34, %v1163_v0  ;;  %v1207_v34 = vrot.slane %v3212_v59, 4  ;;  %v1203_v0 = vrot.slane %v1160_v25, 4 }
 0x188   : > { %v1144_v12 = vperm.slane %v1138_v31, %v3064_v16  ;;  %v1185_v51 = vrot.slane %v1148_v36, 4  ;;  %v1188_v52 = vsel %vm1101_vm1, %v1148_v36, %v1187_v63  ;;  %v3233_v6 = vperm.slane %v1164_v49, %v3120_v37 }
 0x189   : > { %2579 = vset.pattern.permute.xlu2 %v2841_v22  ;;  %702 = vperm.xlu1 %2576, %v691_v53   ;;  %v3222_v32 = vperm.slane %v1188_v52, %v3120_v37 }
 0x18a   : > { %v1173_v47 = vrot.slane %v1144_v12, 4  ;;  %v1186_v58 = vsel %vm1101_vm1, %v1185_v51, %v1136_v24  ;;  %v1176_v2 = vsel %vm1101_vm1, %v1144_v12, %v1175_v60  ;;  %v1199_v24 = vrot.slane %v1156_v9, 4 }
 0x18b   : > { %v3227_v50 = vperm.slane %v1186_v58, %v3120_v37  ;;  %v1184_v20 = vperm.slane %v1176_v2, %v3120_v37  ;;  %v1209_v42 = vrot.slane %v3222_v32, 4  ;;  %v566_v51 = vpop.permute.xlu2 %565 }
 0x18c   : > { %v1174_v53 = vsel %vm1101_vm1, %v1173_v47, %v1132_v15  ;;  %v730_v47 = vperm.slane %v2871_v39, 6 }
 0x18d   : > { %v1180_v5 = vperm.slane %v1174_v53, %v3120_v37  ;;  %v1201_v63 = vrot.slane %v1184_v20, 4  ;;  %v3240_v36 = vsel %vm1101_vm1, %v3227_v50, %v1207_v34  ;;  %v3243_v8 = vsel %vm1101_vm1, %v1184_v20, %v1203_v0 }
 0x18e   : > { %v3247_v15 = vsel %vm1101_vm1, %v1209_v42, %v3233_v6 }
 0x18f   : > { %v1197_v31 = vrot.slane %v1180_v5, 4  ;;  %v1200_v60 = vsel %vm1101_vm1, %v1180_v5, %v1199_v24  ;;  %v3251_v12 = vsel %vm1101_vm1, %v1201_v63, %v1160_v25  ;;  %v553_v25 = vpop.permute.xlu0 %552 }
 0x190   : > { %1551 = vrot.lane.b32.xlu0 %v1200_v60, %s2719_s16  ;;  %v3273_v34 = vsel %vm619_vm0, %v2999_v30, %v553_v25  ;;  %v756_v60 = vperm.slane %v2882_v45, 0 }
 0x191   : > { %728 = vperm.xlu2 %2579, %v717_v21   ;;  %2578 = vset.pattern.permute.xlu1 %v2828_v1  ;;  %v3256_v52 = vsel %vm1101_vm1, %v1197_v31, %v1156_v9 }
 0x193   : > { %v527_v49 = vpop.permute.xlu1 %526  ;;  %v3263_v2 = vpop.permute.xlu2 %578 }
 0x194   : > { %v3261_v58 = vsel %vm619_vm0, %v2966_v19, %v527_v49  ;;  %v3277_v19 = vsel %vm619_vm0, %v3032_v55, %v566_v51  ;;  %v636_v55 = vsel %vm619_vm0, %v2984_v29, %v2953_v14  ;;  %v638_v49 = vsel %vm619_vm0, %v2931_v3, %v3188_v38 }
 0x195   : > { %v1439_v20 = vrot.slane %v3261_v58, 4  ;;  %v1215_v51 = vrot.slane %v636_v55, 4 }
 0x197   : > { %v1440_v0 = vsel %vm1101_vm1, %v3273_v34, %v1439_v20  ;;  %v1227_v20 = vrot.slane %v638_v49, 4 }
 0x199   : > { %741 = vperm.xlu2 %2579, %v730_v47   ;;  %722 = vperm.xlu1 %2578, %v717_v21   ;;  %v640_v21 = vsel %vm619_vm0, %v2973_v23, %v547_v10 }
 0x19a   : > { %v1216_v25 = vsel %vm1101_vm1, %v640_v21, %v1215_v51 }
 0x19b   : > { %v540_v42 = vpop.permute.xlu1 %539  ;;  %v1224_v23 = vperm.slane %v1216_v25, %v3064_v16 }
 0x19c   : > { %v3268_v53 = vsel %vm619_vm0, %v2991_v35, %v540_v42  ;;  %v3288_v35 = vperm.slane %v1440_v0, %v3064_v16  ;;  %v646_v42 = vsel %vm619_vm0, %v3013_v56, %v2960_v17 }
 0x19d   : > { %v1451_v9 = vrot.slane %v3268_v53, 4  ;;  %v1251_v51 = vrot.slane %v646_v42, 4 }
 0x19f   : > { %v1452_v5 = vsel %vm1101_vm1, %v3277_v19, %v1451_v9 }
 0x1a0   : > { %v3284_v24 = vperm.slane %v1452_v5, %v3064_v16 }
 0x1a1   : > { %2581 = vset.pattern.permute.xlu2 %v2828_v1  ;;  %735 = vperm.xlu1 %2578, %v730_v47   ;;  %v1213_v47 = vrot.slane %v640_v21, 4 }
 0x1a2   : > { %v1497_v30 = vrot.slane %v3284_v24, 4 }
 0x1a3   : > { %v599_v63 = vpop.permute.xlu2 %598  ;;  %v1214_v14 = vsel %vm1101_vm1, %v1213_v47, %v636_v55  ;;  %v1275_v47 = vrot.slane %v1224_v23, 4 }
 0x1a4   : > { %v3298_v31 = vsel %vm1101_vm1, %v1497_v30, %v3288_v35  ;;  %v1220_v9 = vperm.slane %v1214_v14, %v3064_v16  ;;  %v648_v55 = vsel %vm619_vm0, %v2940_v7, %v599_v63 }
 0x1a5   : > { %v1237_v25 = vrot.slane %v648_v55, 4 }
 0x1a9   : > { %761 = vperm.xlu2 %2581, %v756_v60   ;;  %2580 = vset.pattern.permute.xlu1 %v2841_v22 }
 0x1ab   : > { %v612_v29 = vpop.permute.xlu2 %611  ;;  %v560_v10 = vpop.permute.xlu1 %559 }
 0x1ac   : > { %v650_v3 = vsel %vm619_vm0, %v3005_v44, %v612_v29  ;;  %v642_v38 = vsel %vm619_vm0, %v2981_v27, %v560_v10  ;;  %v1263_v27 = vrot.slane %v1220_v9, 4  ;;  %v4214_v29 = vperm.slane %v2882_v45, 1 }
 0x1ad   : > { %v1249_v0 = vrot.slane %v650_v3, 4  ;;  %v1225_v5 = vrot.slane %v642_v38, 4  ;;  %v1228_v30 = vsel %vm1101_vm1, %v642_v38, %v1227_v20  ;;  %v1252_v14 = vsel %vm1101_vm1, %v650_v3, %v1251_v51 }
 0x1ae   : > { %v1236_v21 = vperm.slane %v1228_v30, %v3064_v16  ;;  %v4215_v20 = vperm.slane %v2871_v39, 7  ;;  %v1260_v38 = vperm.slane %v1252_v14, %v3064_v16 }
 0x1af   : > { %v1250_v17 = vsel %vm1101_vm1, %v1249_v0, %v646_v42  ;;  %v1226_v44 = vsel %vm1101_vm1, %v1225_v5, %v638_v49 }
 0x1b0   : > { %v1232_v56 = vperm.slane %v1226_v44, %v3064_v16  ;;  %v1276_v7 = vsel %vm1101_vm1, %v1236_v21, %v1275_v47  ;;  %v1256_v63 = vperm.slane %v1250_v17, %v3064_v16  ;;  %v1273_v5 = vrot.slane %v1236_v21, 4 }
 0x1b1   : > { %774 = vperm.xlu2 %2581, %v4214_v29   ;;  %754 = vperm.xlu1 %2580, %v4215_v20   ;;  %v1284_v20 = vperm.slane %v1276_v7, %v3120_v37 }
 0x1b2   : > { %v1261_v10 = vrot.slane %v1232_v56, 4  ;;  %v1264_v49 = vsel %vm1101_vm1, %v1232_v56, %v1263_v27  ;;  %v1285_v51 = vrot.slane %v1256_v63, 4  ;;  %v1297_v27 = vrot.slane %v1260_v38, 4 }
 0x1b3   : > { %v573_v42 = vpop.permute.xlu1 %572  ;;  %v1272_v17 = vperm.slane %v1264_v49, %v3120_v37 }
 0x1b4   : > { %v644_v0 = vsel %vm619_vm0, %v3007_v46, %v573_v42  ;;  %v1262_v3 = vsel %vm1101_vm1, %v1261_v10, %v1220_v9  ;;  %v1274_v9 = vsel %vm1101_vm1, %v1273_v5, %v1224_v23  ;;  %v1449_v23 = vrot.slane %v3277_v19, 4 }
 0x1b5   : > { %v1238_v30 = vsel %vm1101_vm1, %v1237_v25, %v644_v0  ;;  %v1239_v39 = vrot.slane %v644_v0, 4  ;;  %v1268_v44 = vperm.slane %v1262_v3, %v3120_v37  ;;  %v1315_v49 = vrot.slane %v1272_v17, 4 }
 0x1b6   : > { %v1244_v47 = vperm.slane %v1238_v30, %v3064_v16  ;;  %v782_v5 = vperm.slane %v2882_v45, 2 }
 0x1b7   : > { %v1240_v56 = vsel %vm1101_vm1, %v648_v55, %v1239_v39  ;;  %v1311_v25 = vrot.slane %v1268_v44, 4 }
 0x1b8   : > { %v1248_v14 = vperm.slane %v1240_v56, %v3064_v16  ;;  %v1287_v29 = vrot.slane %v1244_v47, 4  ;;  %v1286_v46 = vsel %vm1101_vm1, %v1285_v51, %v1244_v47  ;;  %v1323_v47 = vrot.slane %v1284_v20, 4  ;;  %v618_v56 = vpop.permute.xlu0 %617 }
 0x1b9   : > { %2583 = vset.pattern.permute.xlu2 %v2841_v22  ;;  %767 = vperm.xlu1 %2580, %v756_v60   ;;  %v1292_v21 = vperm.slane %v1286_v46, %v3120_v37 }
 0x1ba   : > { %v1299_v10 = vrot.slane %v1248_v14, 4  ;;  %v1288_v42 = vsel %vm1101_vm1, %v1256_v63, %v1287_v29  ;;  %v1298_v55 = vsel %vm1101_vm1, %v1297_v27, %v1248_v14  ;;  %v1280_v27 = vperm.slane %v1274_v9, %v3120_v37 }
 0x1bb   : > { %v1296_v0 = vperm.slane %v1288_v42, %v3120_v37  ;;  %v1304_v3 = vperm.slane %v1298_v55, %v3120_v37  ;;  %v3351_v30 = vsel %vm1101_vm1, %v1292_v21, %v1311_v25  ;;  %v1309_v60 = vrot.slane %v1292_v21, 4 }
 0x1bc   : > { %v1300_v7 = vsel %vm1101_vm1, %v1260_v38, %v1299_v10  ;;  %v1450_v38 = vsel %vm1101_vm1, %v1449_v23, %v3268_v53  ;;  %v1205_v10 = vrot.slane %v3227_v50, 4  ;;  %v1437_v42 = vrot.slane %v3273_v34, 4 }
 0x1bd   : > { %v1313_v39 = vrot.slane %v1296_v0, 4  ;;  %v3357_v63 = vsel %vm1101_vm1, %v1296_v0, %v1315_v49  ;;  %v1308_v51 = vperm.slane %v1300_v7, %v3120_v37  ;;  %v1317_v14 = vrot.slane %v1304_v3, 4 }
 0x1be   : > { %v3362_v29 = vsel %vm1101_vm1, %v1309_v60, %v1268_v44  ;;  %v651_v53 = vsel %vm619_vm0, %v3025_v13, %v618_v56  ;;  %v795_v0 = vperm.slane %v2882_v45, 3  ;;  %v1206_v34 = vsel %vm1101_vm1, %v1205_v10, %v3212_v59 }
 0x1bf   : > { %4216 = vst [vmem:[#allocation15_spill] sm:$0xff] %v3362_v29  ;;  %v1314_v19 = vsel %vm1101_vm1, %v1313_v39, %v1272_v17  ;;  %v1321_v46 = vrot.slane %v1308_v51, 4  ;;  %v3366_v21 = vsel %vm1101_vm1, %v1308_v51, %v1323_v47  ;;  %v3372_v25 = vsel %vm1101_vm1, %v1317_v14, %v1280_v27 }
 0x1c0   : > { %1561 = vrot.lane.b32.xlu0 %v1314_v19, %s2720_s17  ;;  %v1456_v17 = vperm.slane %v1450_v38, %v3064_v16  ;;  %v3388_v60 = vpop.permute.xlu0 %715  ;;  %v1473_v23 = vrot.slane %v651_v53, 4  ;;  %v645_v13 = vsel %vm619_vm0, %v2988_v33, %v3263_v2  ;;  %v1499_v39 = vrot.slane %v3288_v35, 4 }
 0x1c1   : > { %793 = vperm.xlu2 %2583, %v782_v5   ;;  %2582 = vset.pattern.permute.xlu1 %v2828_v1  ;;  %v3376_v44 = vsel %vm1101_vm1, %v1321_v46, %v1284_v20  ;;  %v1438_v20 = vsel %vm1101_vm1, %v1437_v42, %v3261_v58  ;;  %v1463_v47 = vrot.slane %v645_v13, 4  ;;  %v1504_v35 = vperm.slane %v3298_v31, %v3120_v37 }
 0x1c2   : > { %v1485_v7 = vrot.slane %v1456_v17, 4  ;;  %v1500_v2 = vsel %vm1101_vm1, %v3284_v24, %v1499_v39 }
 0x1c3   : > { %v592_v9 = vpop.permute.xlu1 %591 }
 0x1c4   : > { %v647_v55 = vsel %vm619_vm0, %v2996_v41, %v592_v9  ;;  %v1444_v41 = vperm.slane %v1438_v20, %v3064_v16 }
 0x1c5   : > { %v1475_v49 = vrot.slane %v647_v55, 4  ;;  %v1474_v58 = vsel %vm1101_vm1, %v1473_v23, %v647_v55  ;;  %v1543_v23 = vrot.slane %v1504_v35, 4 }
 0x1c6   : > { %v1486_v59 = vsel %vm1101_vm1, %v1485_v7, %v1444_v41  ;;  %v1480_v14 = vperm.slane %v1474_v58, %v3064_v16  ;;  %v1487_v20 = vrot.slane %v1444_v41, 4 }
 0x1c7   : > { %v1476_v50 = vsel %vm1101_vm1, %v651_v53, %v1475_v49  ;;  %v1492_v10 = vperm.slane %v1486_v59, %v3120_v37 }
 0x1c8   : > { %1575 = vrot.lane.b32.xlu0 %v1206_v34, %s2721_s18  ;;  %v1484_v51 = vperm.slane %v1476_v50, %v3064_v16  ;;  %v1509_v24 = vrot.slane %v1480_v14, 4  ;;  %v3420_v31 = vpop.permute.xlu0 %780  ;;  %v1488_v41 = vsel %vm1101_vm1, %v1456_v17, %v1487_v20 }
 0x1c9   : > { %806 = vperm.xlu2 %2583, %v795_v0   ;;  %787 = vperm.xlu1 %2582, %v782_v5   ;;  %v1319_v5 = vrot.slane %v1280_v27, 4 }
 0x1ca   : > { %v1521_v38 = vrot.slane %v1484_v51, 4 }
 0x1cb   : > { %v605_v56 = vpop.permute.xlu1 %604  ;;  %v1320_v53 = vsel %vm1101_vm1, %v1304_v3, %v1319_v5 }
 0x1cc   : > { %v649_v33 = vsel %vm619_vm0, %v3017_v61, %v605_v56  ;;  %v3415_v61 = vperm.slane %v1500_v2, %v3120_v37  ;;  %v821_v2 = vperm.slane %v2882_v45, 5 }
 0x1cd   : > { %v1461_v19 = vrot.slane %v649_v33, 4  ;;  %v1464_v46 = vsel %vm1101_vm1, %v649_v33, %v1463_v47  ;;  %v1211_v33 = vrot.slane %v3233_v6, 4  ;;  %v3451_v6 = vpop.permute.xlu2 %663 }
 0x1ce   : > { %v1472_v9 = vperm.slane %v1464_v46, %v3064_v16  ;;  %v1547_v59 = vrot.slane %v3415_v61, 4 }
 0x1cf   : > { %v1462_v42 = vsel %vm1101_vm1, %v1461_v19, %v645_v13  ;;  %v1535_v13 = vrot.slane %v1492_v10, 4  ;;  %v1212_v17 = vsel %vm1101_vm1, %v3222_v32, %v1211_v33  ;;  %v4217_v32 = vperm.slane %v2882_v45, 6 }
 0x1d0   : > { %v1468_v55 = vperm.slane %v1462_v42, %v3064_v16  ;;  %v1522_v27 = vsel %vm1101_vm1, %v1521_v38, %v1472_v9  ;;  %v1523_v49 = vrot.slane %v1472_v9, 4  ;;  %1585 = vrot.lane.b32.xlu0 %v1320_v53, %s2722_s22  ;;  %v3456_v9 = vpop.permute.xlu0 %845 }
 0x1d1   : > { %2585 = vset.pattern.permute.xlu2 %v2828_v1  ;;  %800 = vperm.xlu1 %2582, %v795_v0   ;;  %v1528_v3 = vperm.slane %v1522_v27, %v3120_v37 }
 0x1d2   : > { %v1511_v7 = vrot.slane %v1468_v55, 4  ;;  %v1510_v50 = vsel %vm1101_vm1, %v1509_v24, %v1468_v55  ;;  %v1524_v34 = vsel %vm1101_vm1, %v1484_v51, %v1523_v49  ;;  %v4218_v24 = vperm.slane %v2882_v45, 4 }
 0x1d3   : > { %v1516_v58 = vperm.slane %v1510_v50, %v3120_v37  ;;  %v1532_v39 = vperm.slane %v1524_v34, %v3120_v37  ;;  %v1541_v47 = vrot.slane %v1528_v3, 4  ;;  %v3429_v56 = vsel %vm1101_vm1, %v1528_v3, %v1543_v23 }
 0x1d4   : > { %v1512_v0 = vsel %vm1101_vm1, %v1480_v14, %v1511_v7  ;;  %v1496_v14 = vperm.slane %v1488_v41, %v3120_v37  ;;  %v1425_v55 = vrot.slane %v3142_v26, 4  ;;  %v847_v3 = vperm.slane %v2882_v45, 7 }
 0x1d5   : > { %v1520_v51 = vperm.slane %v1512_v0, %v3120_v37  ;;  %v3438_v19 = vsel %vm1101_vm1, %v1516_v58, %v1535_v13  ;;  %v3441_v46 = vsel %vm1101_vm1, %v1541_v47, %v1504_v35  ;;  %v3444_v5 = vsel %vm1101_vm1, %v1532_v39, %v1547_v59  ;;  %v3465_v27 = vpop.permute.xlu2 %676 }
 0x1d6   : > { %v1533_v42 = vrot.slane %v1516_v58, 4  ;;  %v1426_v20 = vsel %vm1101_vm1, %v1425_v55, %v3133_v54  ;;  %v1431_v54 = vrot.slane %v3154_v43, 4  ;;  %v860_v50 = vperm.slane %v2888_v48, 0 }
 0x1d7   : > { %v1537_v38 = vrot.slane %v1520_v51, 4  ;;  %v1545_v58 = vrot.slane %v1532_v39, 4  ;;  %v886_v39 = vperm.slane %v2888_v48, 2 }
 0x1d8   : > { %1599 = vrot.lane.b32.xlu0 %v1212_v17, %s2723_s23  ;;  %v1534_v53 = vsel %vm1101_vm1, %v1533_v42, %v1492_v10  ;;  %v3467_v49 = vpop.permute.xlu0 %910  ;;  %v1539_v10 = vrot.slane %v1496_v14, 4  ;;  %v1432_v34 = vsel %vm1101_vm1, %v3145_v40, %v1431_v54  ;;  %v4225_v54 = vld [vmem:[#allocation8_spill] sm:$0xff] }
 0x1d9   : > { %826 = vperm.xlu2 %2585, %v821_v2   ;;  %2584 = vset.pattern.permute.xlu1 %v2841_v22  ;;  %v3454_v35 = vsel %vm1101_vm1, %v1537_v38, %v1496_v14  ;;  %v1546_v43 = vsel %vm1101_vm1, %v1545_v58, %v3415_v61  ;;  %v912_v14 = vperm.slane %v2888_v48, 4 }
 0x1da   : > { %v1540_v26 = vsel %vm1101_vm1, %v1520_v51, %v1539_v10  ;;  %v4221_v51 = vperm.slane %v2888_v48, 1  ;;  %v951_v10 = vperm.slane %v2888_v48, 7 }
 0x1db   : > { %v3490_v47 = vpop.permute.xlu1 %657 }
 0x1dd   : > { %v3474_v23 = vpop.permute.xlu2 %696 }
 0x1e0   : > { %1609 = vrot.lane.b32.xlu0 %v1534_v53, %s2724_s24  ;;  %v3476_v7 = vpop.permute.xlu0 %975  ;;  %v925_v53 = vperm.slane %v2888_v48, 5 }
 0x1e1   : > { %839 = vperm.xlu2 %2585, %v4217_v32   ;;  %819 = vperm.xlu1 %2584, %v4218_v24  }
 0x1e3   : > { %v671_v59 = vpop.permute.xlu1 %670 }
 0x1e5   : > { %v3485_v45 = vpop.permute.xlu2 %709 }
 0x1e8   : > { %1623 = vrot.lane.b32.xlu0 %v1426_v20, %s2725_s25  ;;  %v3488_v13 = vpop.permute.xlu0 %1040 }
 0x1e9   : > { %2587 = vset.pattern.permute.xlu2 %v2841_v22  ;;  %832 = vperm.xlu1 %2584, %v821_v2   ;;  %v4220_v2 = vperm.slane %v2888_v48, 3 }
 0x1ed   : > { %v3496_v40 = vpop.permute.xlu2 %728 }
 0x1f0   : > { %1633 = vrot.lane.b32.xlu0 %v1540_v26, %s2726_s26 }
 0x1f1   : > { %858 = vperm.xlu2 %2587, %v847_v3   ;;  %2586 = vset.pattern.permute.xlu1 %v2828_v1 }
 0x1f3   : > { %v3506_v33 = vpop.permute.xlu1 %689 }
 0x1f5   : > { %v3504_v61 = vpop.permute.xlu2 %741 }
 0x1f8   : > { %1647 = vrot.lane.b32.xlu0 %v1432_v34, %s2727_s27  ;;  %v4227_v34 = vperm.slane %v2888_v48, 6 }
 0x1f9   : > { %871 = vperm.xlu2 %2587, %v860_v50   ;;  %852 = vperm.xlu1 %2586, %v847_v3  }
 0x200   : > { %1657 = vrot.lane.b32.xlu0 %v1546_v43, %s2728_s28 }
 0x201   : > { %2589 = vset.pattern.permute.xlu2 %v2828_v1  ;;  %865 = vperm.xlu1 %2586, %v860_v50   ;;  %v4226_v50 = vperm.slane %v4225_v54, 0 }
 0x202   : > { %v1552_v41 = vpop.permute.xlu0 %1551 }
 0x203   : > { %v3500_v0 = vsel %vm1669_vm2, %v3256_v52, %v1552_v41  ;;  %v3512_v17 = vpop.permute.xlu2 %761  ;;  %v3515_v52 = vpop.permute.xlu1 %702  ;;  %v977_v41 = vperm.slane %v4225_v54, 1 }
 0x204   : > { %4219 = vst [vmem:[#allocation16_spill] sm:$0xff] %v3500_v0 }
 0x205   : > { %4222 = vst [vmem:[#allocation17_spill] sm:$0xff] %v3512_v17  ;;  %v4234_v17 = vperm.slane %v4225_v54, 5 }
 0x209   : > { %891 = vperm.xlu2 %2589, %v886_v39   ;;  %2588 = vset.pattern.permute.xlu1 %v2841_v22 }
 0x20b   : > { %v3518_v38 = vpop.permute.xlu2 %774  ;;  %v3521_v42 = vpop.permute.xlu1 %722 }
 0x20c   : > { %4223 = vst [vmem:[#allocation18_spill] sm:$0xff] %v3518_v38 }
 0x211   : > { %904 = vperm.xlu2 %2589, %v4220_v2   ;;  %884 = vperm.xlu1 %2588, %v4221_v51   ;;  %v990_v51 = vperm.slane %v4225_v54, 2 }
 0x213   : > { %v3526_v24 = vpop.permute.xlu1 %735 }
 0x219   : > { %2591 = vset.pattern.permute.xlu2 %v2841_v22  ;;  %897 = vperm.xlu1 %2588, %v886_v39  }
 0x21b   : > { %v3524_v32 = vpop.permute.xlu2 %793 }
 0x221   : > { %923 = vperm.xlu2 %2591, %v912_v14   ;;  %2590 = vset.pattern.permute.xlu1 %v2828_v1 }
 0x223   : > { %v3529_v55 = vpop.permute.xlu2 %806  ;;  %v3531_v20 = vpop.permute.xlu1 %754 }
 0x229   : > { %936 = vperm.xlu2 %2591, %v925_v53   ;;  %917 = vperm.xlu1 %2590, %v912_v14  }
 0x22b   : > { %v3537_v26 = vpop.permute.xlu1 %767 }
 0x231   : > { %2593 = vset.pattern.permute.xlu2 %v2828_v1  ;;  %930 = vperm.xlu1 %2590, %v925_v53  }
 0x233   : > { %v3535_v3 = vpop.permute.xlu2 %826 }
 0x234   : > { %4224 = vst [vmem:[#allocation19_spill] sm:$0xff] %v3535_v3  ;;  %v4233_v3 = vld [vmem:[#allocation12_spill] sm:$0xff] }
 0x239   : > { %956 = vperm.xlu2 %2593, %v951_v10   ;;  %2592 = vset.pattern.permute.xlu1 %v2841_v22 }
 0x23b   : > { %v3543_v58 = vpop.permute.xlu1 %787  ;;  %v3545_v43 = vpop.permute.xlu2 %839 }
 0x23c   : > { %4228 = vst [vmem:[#allocation8_spill] sm:$0xff] %v3543_v58 }
 0x23d   : > { %4229 = vst [vmem:[#allocation20_spill] sm:$0xff] %v3545_v43  ;;  %v3566_v43 = vsel %vm619_vm0, %v671_v59, %v4233_v3 }
 0x241   : > { %969 = vperm.xlu2 %2593, %v4226_v50   ;;  %949 = vperm.xlu1 %2592, %v4227_v34   ;;  %v1016_v50 = vperm.slane %v4225_v54, 4 }
 0x243   : > { %v3549_v39 = vpop.permute.xlu1 %800 }
 0x244   : > { %4230 = vst [vmem:[#allocation21_spill] sm:$0xff] %v3549_v39  ;;  %v4235_v39 = vperm.slane %v4225_v54, 3 }
 0x249   : > { %2595 = vset.pattern.permute.xlu2 %v2841_v22  ;;  %962 = vperm.xlu1 %2592, %v951_v10  }
 0x24b   : > { %v3551_v2 = vpop.permute.xlu2 %858 }
 0x251   : > { %988 = vperm.xlu2 %2595, %v977_v41   ;;  %2594 = vset.pattern.permute.xlu1 %v2828_v1 }
 0x253   : > { %v3555_v48 = vpop.permute.xlu1 %819  ;;  %v872_v14 = vpop.permute.xlu2 %871 }
 0x254   : > { %4231 = vst [vmem:[#allocation22_spill] sm:$0xff] %v3555_v48 }
 0x259   : > { %1001 = vperm.xlu2 %2595, %v990_v51   ;;  %982 = vperm.xlu1 %2594, %v977_v41  }
 0x25b   : > { %v3558_v53 = vpop.permute.xlu1 %832 }
 0x261   : > { %2598 = vset.pattern.permute.xlu2 %v2828_v1  ;;  %995 = vperm.xlu1 %2594, %v990_v51   ;;  %v1731_v51 = vrot.slane %v3566_v43, 4 }
 0x263   : > { %v892_v10 = vpop.permute.xlu2 %891 }
 0x269   : > { %1021 = vperm.xlu2 %2598, %v1016_v50   ;;  %2597 = vset.pattern.permute.xlu1 %v2841_v22 }
 0x26b   : > { %v905_v34 = vpop.permute.xlu2 %904  ;;  %v3562_v29 = vpop.permute.xlu1 %852 }
 0x26c   : > { %4232 = vst [vmem:[#allocation23_spill] sm:$0xff] %v3562_v29  ;;  %v3570_v41 = vsel %vm619_vm0, %v3474_v23, %v905_v34  ;;  %v4236_v23 = vld [vmem:[#allocation9_spill] sm:$0xff] }
 0x26d   : > { %v1732_v38 = vsel %vm1101_vm1, %v3570_v41, %v1731_v51  ;;  %v1072_v34 = vsel %vm619_vm0, %v4236_v23, %v892_v10  ;;  %v1042_v10 = vperm.slane %v4225_v54, 6 }
 0x26e   : > { %v1740_v58 = vperm.slane %v1732_v38, %v3064_v16 }
 0x270   : > { %v1777_v48 = vrot.slane %v1740_v58, 4 }
 0x271   : > { %1034 = vperm.xlu2 %2598, %v4234_v17   ;;  %1014 = vperm.xlu1 %2597, %v4235_v39  }
 0x273   : > { %v866_v29 = vpop.permute.xlu1 %865 }
 0x274   : > { %v1068_v59 = vsel %vm619_vm0, %v3490_v47, %v866_v29 }
 0x275   : > { %v1719_v3 = vrot.slane %v1068_v59, 4 }
 0x277   : > { %v1720_v0 = vsel %vm1101_vm1, %v1072_v34, %v1719_v3 }
 0x278   : > { %v1728_v51 = vperm.slane %v1720_v0, %v3064_v16  ;;  %v1075_v0 = vsel %vm619_vm0, %v3515_v52, %v3467_v49 }
 0x279   : > { %2600 = vset.pattern.permute.xlu2 %v2841_v22  ;;  %1027 = vperm.xlu1 %2597, %v1016_v50   ;;  %v1953_v22 = vrot.slane %v1075_v0, 4 }
 0x27a   : > { %v1779_v17 = vrot.slane %v1728_v51, 4  ;;  %v3588_v39 = vsel %vm1101_vm1, %v1777_v48, %v1728_v51  ;;  %v1069_v51 = vsel %vm619_vm0, %v3451_v6, %v872_v14 }
 0x27b   : > { %v924_v38 = vpop.permute.xlu2 %923 }
 0x27c   : > { %v3592_v29 = vsel %vm619_vm0, %v3388_v60, %v924_v38  ;;  %v3595_v47 = vsel %vm1101_vm1, %v1740_v58, %v1779_v17  ;;  %v1055_v58 = vperm.slane %v4225_v54, 7 }
 0x281   : > { %1053 = vperm.xlu2 %2600, %v1042_v10   ;;  %2599 = vset.pattern.permute.xlu1 %v2828_v1  ;;  %v1943_v1 = vrot.slane %v1069_v51, 4 }
 0x283   : > { %v885_v48 = vpop.permute.xlu1 %884 }
 0x284   : > { %v1071_v50 = vsel %vm619_vm0, %v3465_v27, %v885_v48 }
 0x285   : > { %v1954_v60 = vsel %vm1101_vm1, %v1953_v22, %v1071_v50  ;;  %v1955_v3 = vrot.slane %v1071_v50, 4 }
 0x286   : > { %v1960_v17 = vperm.slane %v1954_v60, %v3064_v16 }
 0x287   : > { %v1956_v23 = vsel %vm1101_vm1, %v1075_v0, %v1955_v3  ;;  %v3620_v3 = vpop.permute.xlu2 %936 }
 0x288   : > { %v1964_v49 = vperm.slane %v1956_v23, %v3064_v16  ;;  %v1989_v6 = vrot.slane %v1960_v17, 4 }
 0x289   : > { %1066 = vperm.xlu2 %2600, %v1055_v58   ;;  %1047 = vperm.xlu1 %2599, %v1042_v10  }
 0x28a   : > { %v2001_v54 = vrot.slane %v1964_v49, 4 }
 0x28b   : > { %v898_v52 = vpop.permute.xlu1 %897 }
 0x28c   : > { %v1073_v27 = vsel %vm619_vm0, %v3506_v33, %v898_v52 }
 0x28d   : > { %v1941_v38 = vrot.slane %v1073_v27, 4  ;;  %v1944_v22 = vsel %vm1101_vm1, %v1073_v27, %v1943_v1  ;;  %v1729_v1 = vrot.slane %v3570_v41, 4 }
 0x28e   : > { %v1952_v0 = vperm.slane %v1944_v22, %v3064_v16  ;;  %v4237_v22 = vld [vmem:[#allocation13_spill] sm:$0xff] }
 0x28f   : > { %v1942_v48 = vsel %vm1101_vm1, %v1941_v38, %v1069_v51 }
 0x290   : > { %v1948_v14 = vperm.slane %v1942_v48, %v3064_v16  ;;  %v2003_v10 = vrot.slane %v1952_v0, 4  ;;  %v3618_v50 = vsel %vm1101_vm1, %v2001_v54, %v1952_v0 }
 0x291   : > { %1060 = vperm.xlu1 %2599, %v1055_v58   ;;  %1559 = vrot.lane.b32.xlu2 %v3251_v12, %s2720_s17  ;;  %v1717_v12 = vrot.slane %v1072_v34, 4  ;;  %v1730_v58 = vsel %vm1101_vm1, %v1729_v1, %v3566_v43  ;;  %v4238_v34 = vld [vmem:[#allocation10_spill] sm:$0xff] }
 0x292   : > { %v1991_v33 = vrot.slane %v1948_v14, 4  ;;  %v3625_v60 = vsel %vm1101_vm1, %v1989_v6, %v1948_v14  ;;  %v3628_v23 = vsel %vm1101_vm1, %v1964_v49, %v2003_v10  ;;  %v3644_v41 = vperm.slane %v1730_v58, %v3064_v16 }
 0x293   : > { %v957_v52 = vpop.permute.xlu2 %956  ;;  %v1788_v58 = vperm.slane %v3595_v47, %v3120_v37  ;;  %v1784_v47 = vperm.slane %v3588_v39, %v3120_v37 }
 0x294   : > { %v3631_v51 = vsel %vm1101_vm1, %v1960_v17, %v1991_v33  ;;  %v1718_v17 = vsel %vm1101_vm1, %v1717_v12, %v1068_v59  ;;  %v1082_v43 = vsel %vm619_vm0, %v4238_v34, %v957_v52 }
 0x295   : > { %v1753_v0 = vrot.slane %v1082_v43, 4 }
 0x299   : > { %1569 = vrot.lane.b32.xlu2 %v3357_v63, %s2729_s29  ;;  %1553 = vrot.lane.b32.xlu1 %v3351_v30, %s2719_s16  ;;  %v1080_v63 = vsel %vm619_vm0, %v3526_v24, %v4237_v22  ;;  %v3650_v30 = vperm.slane %v1718_v17, %v3064_v16 }
 0x29a   : > { %v1741_v59 = vrot.slane %v1080_v63, 4 }
 0x29b   : > { %v918_v27 = vpop.permute.xlu1 %917  ;;  %v3660_v48 = vpop.permute.xlu2 %969 }
 0x29c   : > { %v1076_v49 = vsel %vm619_vm0, %v3485_v45, %v918_v27  ;;  %v1765_v45 = vrot.slane %v3644_v41, 4 }
 0x29d   : > { %v1743_v38 = vrot.slane %v1076_v49, 4 }
 0x29e   : > { %v1766_v10 = vsel %vm1101_vm1, %v1765_v45, %v3650_v30 }
 0x29f   : > { %v1744_v54 = vsel %vm1101_vm1, %v1080_v63, %v1743_v38  ;;  %v1772_v12 = vperm.slane %v1766_v10, %v3120_v37 }
 0x2a0   : > { %v1752_v6 = vperm.slane %v1744_v54, %v3064_v16 }
 0x2a1   : > { %1583 = vrot.lane.b32.xlu2 %v3240_v36, %s2722_s22  ;;  %1567 = vrot.lane.b32.xlu1 %v3243_v8, %s2729_s29  ;;  %v1742_v36 = vsel %vm1101_vm1, %v1741_v59, %v1076_v49  ;;  %v1815_v54 = vrot.slane %v1772_v12, 4  ;;  %v1827_v59 = vrot.slane %v1788_v58, 4 }
 0x2a2   : > { %v1803_v27 = vrot.slane %v1752_v6, 4 }
 0x2a3   : > { %v931_v24 = vpop.permute.xlu1 %930 }
 0x2a4   : > { %v1078_v14 = vsel %vm619_vm0, %v3521_v42, %v931_v24  ;;  %v3677_v42 = vperm.slane %v1742_v36, %v3064_v16 }
 0x2a5   : > { %v1754_v33 = vsel %vm1101_vm1, %v1753_v0, %v1078_v14  ;;  %v1755_v8 = vrot.slane %v1078_v14, 4  ;;  %v1823_v14 = vrot.slane %v1784_v47, 4 }
 0x2a6   : > { %v3670_v1 = vperm.slane %v1754_v33, %v3064_v16 }
 0x2a7   : > { %v1756_v52 = vsel %vm1101_vm1, %v1082_v43, %v1755_v8 }
 0x2a8   : > { %v1764_v17 = vperm.slane %v1756_v52, %v3064_v16  ;;  %v1789_v49 = vrot.slane %v3670_v1, 4 }
 0x2a9   : > { %1593 = vrot.lane.b32.xlu2 %v3376_v44, %s2730_s30  ;;  %1577 = vrot.lane.b32.xlu1 %v3372_v25, %s2721_s18 }
 0x2aa   : > { %v1801_v38 = vrot.slane %v1764_v17, 4  ;;  %v1790_v22 = vsel %vm1101_vm1, %v1789_v49, %v3677_v42  ;;  %v1804_v63 = vsel %vm1101_vm1, %v1764_v17, %v1803_v27  ;;  %v1967_v17 = vrot.slane %v3592_v29, 4 }
 0x2ab   : > { %v989_v34 = vpop.permute.xlu2 %988  ;;  %v1796_v43 = vperm.slane %v1790_v22, %v3120_v37  ;;  %v1812_v45 = vperm.slane %v1804_v63, %v3120_v37 }
 0x2ac   : > { %v3694_v44 = vsel %vm619_vm0, %v3420_v31, %v989_v34  ;;  %v1802_v25 = vsel %vm1101_vm1, %v1801_v38, %v1752_v6  ;;  %v1085_v31 = vsel %vm619_vm0, %v3537_v26, %v3476_v7 }
 0x2ad   : > { %v1813_v0 = vrot.slane %v1796_v43, 4  ;;  %v1816_v24 = vsel %vm1101_vm1, %v1796_v43, %v1815_v54  ;;  %v1808_v39 = vperm.slane %v1802_v25, %v3120_v37  ;;  %v1825_v10 = vrot.slane %v1812_v45, 4 }
 0x2ae   : > { %2167 = vrot.lane.b32.xlu0 %v1816_v24, %s2719_s16  ;;  %v3701_v36 = vsel %vm1101_vm1, %v1812_v45, %v1827_v59  ;;  %v2055_v27 = vrot.slane %v1085_v31, 4 }
 0x2af   : > { %v3704_v33 = vsel %vm1101_vm1, %v1813_v0, %v1772_v12  ;;  %v3710_v6 = vsel %vm1101_vm1, %v1808_v39, %v1823_v14  ;;  %v1821_v8 = vrot.slane %v1808_v39, 4  ;;  %v3713_v52 = vsel %vm1101_vm1, %v1825_v10, %v1788_v58 }
 0x2b0   : > { %v2008_v0 = vperm.slane %v3618_v50, %v3120_v37 }
 0x2b1   : > { %1591 = vrot.lane.b32.xlu1 %v3247_v15, %s2730_s30  ;;  %1607 = vrot.lane.b32.xlu2 %v3157_v4, %s2724_s24  ;;  %v3720_v12 = vsel %vm1101_vm1, %v1821_v8, %v1784_v47 }
 0x2b3   : > { %v1002_v7 = vpop.permute.xlu2 %1001  ;;  %v950_v26 = vpop.permute.xlu1 %949 }
 0x2b4   : > { %v1089_v49 = vsel %vm619_vm0, %v3524_v32, %v1002_v7  ;;  %v1081_v58 = vsel %vm619_vm0, %v3504_v61, %v950_v26  ;;  %v1079_v32 = vsel %vm619_vm0, %v3496_v40, %v3620_v3  ;;  %v2012_v40 = vperm.slane %v3628_v23, %v3120_v37 }
 0x2b5   : > { %v2053_v38 = vrot.slane %v1089_v49, 4  ;;  %v3728_v15 = vsel %vm1101_vm1, %v1089_v49, %v2055_v27  ;;  %v1965_v22 = vrot.slane %v1081_v58, 4  ;;  %v1968_v4 = vsel %vm1101_vm1, %v1081_v58, %v1967_v17 }
 0x2b6   : > { %v1976_v61 = vperm.slane %v1968_v4, %v3064_v16  ;;  %v1979_v34 = vrot.slane %v1079_v32, 4  ;;  %v1996_v23 = vperm.slane %v3625_v60, %v3120_v37  ;;  %v2051_v10 = vrot.slane %v2012_v40, 4 }
 0x2b7   : > { %v3732_v47 = vsel %vm1101_vm1, %v2053_v38, %v1085_v31  ;;  %v1966_v63 = vsel %vm1101_vm1, %v1965_v22, %v3592_v29  ;;  %v2047_v60 = vrot.slane %v2008_v0, 4 }
 0x2b8   : > { %v1972_v54 = vperm.slane %v1966_v63, %v3064_v16  ;;  %v2039_v38 = vrot.slane %v1996_v23, 4 }
 0x2b9   : > { %1601 = vrot.lane.b32.xlu1 %v3366_v21, %s2723_s23  ;;  %1617 = vrot.lane.b32.xlu2 %v3438_v19, %s2731_s2  ;;  %v2027_v21 = vrot.slane %v1976_v61, 4  ;;  %v2000_v19 = vperm.slane %v3631_v51, %v3120_v37 }
 0x2ba   : > { %v2015_v24 = vrot.slane %v1972_v54, 4 }
 0x2bb   : > { %v963_v43 = vpop.permute.xlu1 %962  ;;  %v2043_v8 = vrot.slane %v2000_v19, 4 }
 0x2bc   : > { %v1083_v29 = vsel %vm619_vm0, %v3531_v20, %v963_v43 }
 0x2bd   : > { %v1977_v45 = vrot.slane %v1083_v29, 4  ;;  %v1980_v25 = vsel %vm1101_vm1, %v1083_v29, %v1979_v34 }
 0x2be   : > { %v1988_v3 = vperm.slane %v1980_v25, %v3064_v16 }
 0x2bf   : > { %v1978_v59 = vsel %vm1101_vm1, %v1977_v45, %v1079_v32 }
 0x2c0   : > { %v1984_v20 = vperm.slane %v1978_v59, %v3064_v16  ;;  %v2025_v39 = vrot.slane %v1988_v3, 4  ;;  %v2028_v14 = vsel %vm1101_vm1, %v1988_v3, %v2027_v21  ;;  %v1791_v3 = vrot.slane %v3677_v42, 4 }
 0x2c1   : > { %1615 = vrot.lane.b32.xlu1 %v3148_v57, %s2731_s2  ;;  %1631 = vrot.lane.b32.xlu2 %v3161_v11, %s2726_s26  ;;  %v2036_v51 = vperm.slane %v2028_v14, %v3120_v37  ;;  %v1095_v14 = vsel %vm619_vm0, %v3558_v53, %v3488_v13 }
 0x2c2   : > { %v2013_v31 = vrot.slane %v1984_v20, 4  ;;  %v2016_v50 = vsel %vm1101_vm1, %v1984_v20, %v2015_v24  ;;  %v2026_v27 = vsel %vm1101_vm1, %v2025_v39, %v1976_v61 }
 0x2c3   : > { %v2024_v17 = vperm.slane %v2016_v50, %v3120_v37  ;;  %v2049_v7 = vrot.slane %v2036_v51, 4  ;;  %v2032_v57 = vperm.slane %v2026_v27, %v3120_v37  ;;  %v3770_v26 = vsel %vm1101_vm1, %v2036_v51, %v2051_v10  ;;  %v3794_v45 = vpop.permute.xlu2 %1021 }
 0x2c4   : > { %v2014_v11 = vsel %vm1101_vm1, %v2013_v31, %v1972_v54  ;;  %v3789_v54 = vpop.permute.xlu0 %1561  ;;  %v2091_v50 = vrot.slane %v1095_v14, 4 }
 0x2c5   : > { %v2020_v49 = vperm.slane %v2014_v11, %v3120_v37  ;;  %v3775_v58 = vsel %vm1101_vm1, %v2024_v17, %v2043_v8  ;;  %v2041_v22 = vrot.slane %v2024_v17, 4  ;;  %v3778_v4 = vsel %vm1101_vm1, %v2049_v7, %v2012_v40 }
 0x2c6   : > { %v2045_v63 = vrot.slane %v2032_v57, 4  ;;  %v3781_v32 = vsel %vm1101_vm1, %v2032_v57, %v2047_v60 }
 0x2c7   : > { %v2037_v61 = vrot.slane %v2020_v49, 4  ;;  %v3784_v34 = vsel %vm1101_vm1, %v2020_v49, %v2039_v38  ;;  %v3787_v43 = vsel %vm1101_vm1, %v2041_v22, %v2000_v19  ;;  %v1767_v19 = vrot.slane %v3650_v30, 4 }
 0x2c8   : > { %v3792_v29 = vsel %vm1101_vm1, %v2045_v63, %v2008_v0 }
 0x2c9   : > { %1625 = vrot.lane.b32.xlu1 %v3454_v35, %s2725_s25  ;;  %1641 = vrot.lane.b32.xlu2 %v3441_v46, %s2732_s3  ;;  %v3801_v25 = vsel %vm1101_vm1, %v2037_v61, %v1996_v23  ;;  %v1792_v46 = vsel %vm1101_vm1, %v3670_v1, %v1791_v3  ;;  %v1768_v42 = vsel %vm1101_vm1, %v3644_v41, %v1767_v19  ;;  %v4239_v61 = vld [vmem:[#allocation22_spill] sm:$0xff] }
 0x2ca   : > { %v3818_v59 = vperm.slane %v1792_v46, %v3120_v37  ;;  %v3830_v30 = vperm.slane %v1768_v42, %v3120_v37  ;;  %v2064_v41 = vperm.slane %v3728_v15, %v3064_v16  ;;  %v4240_v46 = vld [vmem:[#allocation16_spill] sm:$0xff] }
 0x2cb   : > { %v3803_v40 = vpop.permute.xlu1 %982  ;;  %v3812_v35 = vpop.permute.xlu2 %1034 }
 0x2cc   : > { %v3809_v21 = vpop.permute.xlu0 %1575  ;;  %v1817_v1 = vrot.slane %v3818_v59, 4  ;;  %v2115_v27 = vrot.slane %v2064_v41, 4 }
 0x2ce   : > { %v1818_v24 = vsel %vm1101_vm1, %v1817_v1, %v3830_v30 }
 0x2d1   : > { %1639 = vrot.lane.b32.xlu1 %v3171_v28, %s2732_s3  ;;  %1655 = vrot.lane.b32.xlu2 %v3178_v62, %s2728_s28 }
 0x2d3   : > { %v996_v28 = vpop.permute.xlu1 %995 }
 0x2d4   : > { %v3826_v0 = vpop.permute.xlu0 %1585 }
 0x2d9   : > { %1649 = vrot.lane.b32.xlu1 %v3429_v56, %s2727_s27  ;;  %1665 = vrot.lane.b32.xlu2 %v3444_v5, %s2733_s4  ;;  %v2067_v56 = vrot.slane %v3694_v44, 4  ;;  %v2060_v5 = vperm.slane %v3732_v47, %v3064_v16 }
 0x2db   : > { %v1054_v62 = vpop.permute.xlu2 %1053  ;;  %v2103_v8 = vrot.slane %v2060_v5, 4 }
 0x2dc   : > { %v3850_v47 = vpop.permute.xlu0 %1599 }
 0x2e1   : > { %1663 = vrot.lane.b32.xlu1 %v3174_v18, %s2733_s4  ;;  %2175 = vrot.lane.b32.xlu2 %v1818_v24, %s2720_s17 }
 0x2e3   : > { %v1067_v20 = vpop.permute.xlu2 %1066  ;;  %v1015_v39 = vpop.permute.xlu1 %1014 }
 0x2e4   : > { %v1099_v23 = vsel %vm619_vm0, %v3551_v2, %v1067_v20  ;;  %v1091_v18 = vsel %vm619_vm0, %v3529_v55, %v1015_v39  ;;  %v1097_v2 = vsel %vm619_vm0, %v3456_v9, %v1054_v62 }
 0x2e5   : > { %v2089_v51 = vrot.slane %v1099_v23, 4  ;;  %v2065_v10 = vrot.slane %v1091_v18, 4  ;;  %v2068_v31 = vsel %vm1101_vm1, %v1091_v18, %v2067_v56  ;;  %v2092_v7 = vsel %vm1101_vm1, %v1099_v23, %v2091_v50  ;;  %v4241_v56 = vld [vmem:[#allocation8_spill] sm:$0xff] }
 0x2e6   : > { %v2076_v15 = vperm.slane %v2068_v31, %v3064_v16  ;;  %v2077_v38 = vrot.slane %v1097_v2, 4  ;;  %v2100_v63 = vperm.slane %v2092_v7, %v3064_v16 }
 0x2e7   : > { %v2066_v13 = vsel %vm1101_vm1, %v2065_v10, %v3694_v44  ;;  %v2090_v53 = vsel %vm1101_vm1, %v2089_v51, %v1095_v14  ;;  %v3882_v51 = vpop.permute.xlu0 %1609 }
 0x2e8   : > { %v2072_v55 = vperm.slane %v2066_v13, %v3064_v16  ;;  %v2113_v17 = vrot.slane %v2076_v15, 4  ;;  %v2116_v57 = vsel %vm1101_vm1, %v2076_v15, %v2115_v27  ;;  %v2096_v44 = vperm.slane %v2090_v53, %v3064_v16 }
 0x2e9   : > { %v2124_v18 = vperm.slane %v2116_v57, %v3120_v37 }
 0x2ea   : > { %v2101_v11 = vrot.slane %v2072_v55, 4  ;;  %v2114_v60 = vsel %vm1101_vm1, %v2113_v17, %v2064_v41  ;;  %v2104_v49 = vsel %vm1101_vm1, %v2072_v55, %v2103_v8  ;;  %v3876_v41 = vsel %vm619_vm0, %v4241_v56, %v996_v28 }
 0x2eb   : > { %v1028_v22 = vpop.permute.xlu1 %1027  ;;  %v1560_v9 = vpop.permute.xlu2 %1559  ;;  %v2125_v39 = vrot.slane %v2096_v44, 4  ;;  %v2112_v23 = vperm.slane %v2104_v49, %v3120_v37  ;;  %v2120_v15 = vperm.slane %v2114_v60, %v3120_v37  ;;  %v1829_v28 = vrot.slane %v3876_v41, 4 }
 0x2ec   : > { %v1093_v3 = vsel %vm619_vm0, %v4239_v61, %v1028_v22  ;;  %v3869_v19 = vsel %vm1672_vm3, %v4240_v46, %v1560_v9  ;;  %v2102_v62 = vsel %vm1101_vm1, %v2101_v11, %v2060_v5  ;;  %v2137_v5 = vrot.slane %v2100_v63, 4 }
 0x2ed   : > { %v2078_v42 = vsel %vm1101_vm1, %v2077_v38, %v1093_v3  ;;  %v2079_v1 = vrot.slane %v1093_v3, 4  ;;  %v2108_v24 = vperm.slane %v2102_v62, %v3120_v37  ;;  %v2155_v57 = vrot.slane %v2112_v23, 4 }
 0x2ee   : > { %v2084_v20 = vperm.slane %v2078_v42, %v3064_v16  ;;  %v2163_v11 = vrot.slane %v2124_v18, 4  ;;  %v2159_v22 = vrot.slane %v2120_v15, 4 }
 0x2ef   : > { %v2080_v14 = vsel %vm1101_vm1, %v1097_v2, %v2079_v1  ;;  %v2151_v8 = vrot.slane %v2108_v24, 4 }
 0x2f0   : > { %v2088_v10 = vperm.slane %v2080_v14, %v3064_v16  ;;  %v2127_v31 = vrot.slane %v2084_v20, 4  ;;  %v2126_v50 = vsel %vm1101_vm1, %v2125_v39, %v2084_v20  ;;  %v4242_v20 = vld [vmem:[#allocation14_spill] sm:$0xff]  ;;  %v4243_v39 = vld [vmem:[#allocation21_spill] sm:$0xff] }
 0x2f1   : > { %v2132_v13 = vperm.slane %v2126_v50, %v3120_v37  ;;  %v1090_v14 = vsel %vm619_vm0, %v4243_v39, %v4242_v20  ;;  %v4249_v20 = vld [vmem:[#allocation23_spill] sm:$0xff] }
 0x2f2   : > { %v2139_v27 = vrot.slane %v2088_v10, 4  ;;  %v2138_v2 = vsel %vm1101_vm1, %v2137_v5, %v2088_v10  ;;  %v2128_v53 = vsel %vm1101_vm1, %v2096_v44, %v2127_v31 }
 0x2f3   : > { %v3891_v55 = vpop.permute.xlu2 %1569  ;;  %v2144_v17 = vperm.slane %v2138_v2, %v3120_v37  ;;  %v2136_v7 = vperm.slane %v2128_v53, %v3120_v37  ;;  %v3896_v60 = vsel %vm1101_vm1, %v2132_v13, %v2151_v8  ;;  %v2149_v49 = vrot.slane %v2132_v13, 4  ;;  %v4246_v53 = vld [vmem:[#allocation20_spill] sm:$0xff] }
 0x2f4   : > { %v2140_v38 = vsel %vm1101_vm1, %v2100_v63, %v2139_v27  ;;  %v1841_v8 = vrot.slane %v1090_v14, 4 }
 0x2f5   : > { %v2157_v9 = vrot.slane %v2144_v17, 4  ;;  %v2153_v61 = vrot.slane %v2136_v7, 4  ;;  %v3900_v3 = vsel %vm1101_vm1, %v2136_v7, %v2155_v57  ;;  %v2148_v44 = vperm.slane %v2140_v38, %v3120_v37 }
 0x2f6   : > { %v3904_v46 = vsel %vm1101_vm1, %v2149_v49, %v2108_v24  ;;  %v3907_v62 = vsel %vm1101_vm1, %v2144_v17, %v2159_v22  ;;  %v4244_v24 = vld [vmem:[#allocation17_spill] sm:$0xff]  ;;  %v4248_v49 = vld [vmem:[#allocation19_spill] sm:$0xff] }
 0x2f7   : > { %v3910_v42 = vsel %vm1101_vm1, %v2157_v9, %v2120_v15  ;;  %v3913_v1 = vsel %vm1101_vm1, %v2153_v61, %v2112_v23  ;;  %v3916_v63 = vsel %vm1101_vm1, %v2148_v44, %v2163_v11  ;;  %v2161_v56 = vrot.slane %v2148_v44, 4  ;;  %v3928_v15 = vpop.permute.xlu0 %1623  ;;  %v4245_v23 = vld [vmem:[#allocation18_spill] sm:$0xff] }
 0x2f8   : > { %v1084_v5 = vsel %vm619_vm0, %v4244_v24, %v3660_v48  ;;  %v1086_v50 = vsel %vm619_vm0, %v4245_v23, %v3803_v40  ;;  %v1094_v38 = vsel %vm619_vm0, %v4248_v49, %v3812_v35 }
 0x2f9   : > { %v1830_v10 = vsel %vm1101_vm1, %v1829_v28, %v1084_v5  ;;  %v3926_v31 = vsel %vm1101_vm1, %v2161_v56, %v2124_v18  ;;  %v1842_v28 = vsel %vm1101_vm1, %v1841_v8, %v1086_v50  ;;  %v4247_v18 = vld [vmem:[#allocation11_spill] sm:$0xff]  ;;  %v1867_v8 = vrot.slane %v1094_v38, 4 }
 0x2fa   : > { %v1836_v2 = vperm.slane %v1830_v10, %v3064_v16  ;;  %v1092_v7 = vsel %vm619_vm0, %v4247_v18, %v3794_v45  ;;  %v1848_v57 = vperm.slane %v1842_v28, %v3064_v16 }
 0x2fb   : > { %v1048_v27 = vpop.permute.xlu1 %1047  ;;  %v3933_v13 = vpop.permute.xlu2 %1583  ;;  %v1855_v10 = vrot.slane %v1092_v7, 4 }
 0x2fc   : > { %v1096_v48 = vsel %vm619_vm0, %v4246_v53, %v1048_v27  ;;  %v1879_v11 = vrot.slane %v1836_v2, 4  ;;  %v1877_v44 = vrot.slane %v1848_v57, 4  ;;  %v1843_v27 = vrot.slane %v1086_v50, 4 }
 0x2fd   : > { %v1853_v17 = vrot.slane %v1096_v48, 4  ;;  %v1856_v18 = vsel %vm1101_vm1, %v1096_v48, %v1855_v10 }
 0x2fe   : > { %v1880_v39 = vsel %vm1101_vm1, %v1848_v57, %v1879_v11  ;;  %v1878_v23 = vsel %vm1101_vm1, %v1877_v44, %v1836_v2  ;;  %v1831_v57 = vrot.slane %v1084_v5, 4  ;;  %v1844_v2 = vsel %vm1101_vm1, %v1090_v14, %v1843_v27 }
 0x2ff   : > { %v1854_v40 = vsel %vm1101_vm1, %v1853_v17, %v1092_v7  ;;  %v3949_v61 = vpop.permute.xlu0 %1633  ;;  %v1888_v53 = vperm.slane %v1880_v39, %v3120_v37  ;;  %v1884_v49 = vperm.slane %v1878_v23, %v3120_v37 }
 0x300   : > { %v1860_v56 = vperm.slane %v1854_v40, %v3064_v16  ;;  %v1832_v48 = vsel %vm1101_vm1, %v3876_v41, %v1831_v57 }
 0x301   : > { %v1931_v44 = vrot.slane %v1888_v53, 4 }
 0x302   : > { %v1903_v28 = vrot.slane %v1860_v56, 4 }
 0x303   : > { %v1061_v22 = vpop.permute.xlu1 %1060  ;;  %v3947_v9 = vpop.permute.xlu2 %1593 }
 0x304   : > { %v1098_v45 = vsel %vm619_vm0, %v4249_v20, %v1061_v22  ;;  %v1864_v20 = vperm.slane %v1856_v18, %v3064_v16  ;;  %vm1708_vm0 = vcmask 228352  }
 0x305   : > { %v1865_v24 = vrot.slane %v1098_v45, 4  ;;  %v1868_v40 = vsel %vm1101_vm1, %v1098_v45, %v1867_v8 }
 0x306   : > { %v1876_v45 = vperm.slane %v1868_v40, %v3064_v16 }
 0x307   : > { %v1866_v35 = vsel %vm1101_vm1, %v1865_v24, %v1094_v38  ;;  %v1927_v24 = vrot.slane %v1884_v49, 4  ;;  %v3976_v23 = vpop.permute.xlu0 %1647 }
 0x308   : > { %v1872_v17 = vperm.slane %v1866_v35, %v3064_v16  ;;  %v1852_v35 = vperm.slane %v1844_v2, %v3064_v16 }
 0x30a   : > { %v1901_v11 = vrot.slane %v1872_v17, 4  ;;  %v1904_v7 = vsel %vm1101_vm1, %v1872_v17, %v1903_v28  ;;  %v1840_v28 = vperm.slane %v1832_v48, %v3064_v16  ;;  %v1913_v17 = vrot.slane %v1876_v45, 4 }
 0x30b   : > { %v3964_v50 = vpop.permute.xlu1 %1553  ;;  %v3966_v38 = vpop.permute.xlu2 %1607  ;;  %v1912_v22 = vperm.slane %v1904_v7, %v3120_v37  ;;  %v1819_v16 = vrot.slane %v3830_v30, 4 }
 0x30c   : > { %v1902_v5 = vsel %vm1101_vm1, %v1901_v11, %v1860_v56  ;;  %v1915_v56 = vrot.slane %v1864_v20, 4  ;;  %v1891_v7 = vrot.slane %v1840_v28, 4  ;;  %v1914_v2 = vsel %vm1101_vm1, %v1913_v17, %v1864_v20 }
 0x30d   : > { %v1932_v39 = vsel %vm1101_vm1, %v1912_v22, %v1931_v44  ;;  %v1908_v14 = vperm.slane %v1902_v5, %v3120_v37  ;;  %v1929_v10 = vrot.slane %v1912_v22, 4  ;;  %v1920_v48 = vperm.slane %v1914_v2, %v3120_v37 }
 0x30e   : > { %2185 = vrot.lane.b32.xlu2 %v1932_v39, %s2729_s29  ;;  %v1916_v40 = vsel %vm1101_vm1, %v1876_v45, %v1915_v56  ;;  %v1892_v30 = vsel %vm1101_vm1, %v1852_v35, %v1891_v7 }
 0x30f   : > { %v1928_v8 = vsel %vm1101_vm1, %v1908_v14, %v1927_v24  ;;  %v1930_v41 = vsel %vm1101_vm1, %v1929_v10, %v1888_v53  ;;  %v1925_v27 = vrot.slane %v1908_v14, 4  ;;  %v1889_v53 = vrot.slane %v1852_v35, 4  ;;  %v4000_v45 = vpop.permute.xlu0 %1657 }
 0x310   : > { %2169 = vrot.lane.b32.xlu1 %v1928_v8, %s2719_s16  ;;  %2177 = vrot.lane.b32.xlu0 %v1930_v41, %s2720_s17  ;;  %v1924_v22 = vperm.slane %v1916_v40, %v3120_v37  ;;  %v1900_v14 = vperm.slane %v1892_v30, %v3120_v37  ;;  %v4250_v40 = vld [vmem:[#allocation15_spill] sm:$0xff]  ;;  %s2462_s16 = sshll.u32 %s2705_s9, 4 }
 0x311   : > { %v3986_v18 = vsel %vm1101_vm1, %v1925_v27, %v1884_v49  ;;  %v1890_v44 = vsel %vm1101_vm1, %v1889_v53, %v1840_v28  ;;  %v1820_v49 = vsel %vm1101_vm1, %v3818_v59, %v1819_v16  ;;  %v1933_v59 = vrot.slane %v1920_v48, 4 }
 0x312   : > { %v1937_v20 = vrot.slane %v1924_v22, 4  ;;  %v1896_v5 = vperm.slane %v1890_v44, %v3120_v37  ;;  %v1939_v17 = vrot.slane %v1900_v14, 4  ;;  %v1671_v53 = vsel %vm1669_vm2, %v4250_v40, %v3964_v50 }
 0x313   : > { %v1568_v57 = vpop.permute.xlu1 %1567  ;;  %v3989_v11 = vpop.permute.xlu2 %1617 }
 0x314   : > { %v1938_v24 = vsel %vm1101_vm1, %v1937_v20, %v1900_v14  ;;  %v1935_v10 = vrot.slane %v1896_v5, 4  ;;  %v1934_v8 = vsel %vm1101_vm1, %v1933_v59, %v1896_v5  ;;  %v1676_v7 = vsel %vm1675_vm4, %v3869_v19, %v1568_v57 }
 0x316   : > { %2199 = vrot.lane.b32.xlu2 %v3710_v6, %s2722_s22 }
 0x318   : > { %2183 = vrot.lane.b32.xlu1 %v1820_v49, %s2729_s29  ;;  %2191 = vrot.lane.b32.xlu0 %v3720_v12, %s2721_s18  ;;  %v1936_v12 = vsel %vm1101_vm1, %v1920_v48, %v1935_v10 }
 0x31b   : > { %v1578_v6 = vpop.permute.xlu1 %1577  ;;  %v4007_v39 = vpop.permute.xlu2 %1631 }
 0x31e   : > { %2209 = vrot.lane.b32.xlu2 %v1938_v24, %s2730_s30 }
 0x320   : > { %2193 = vrot.lane.b32.xlu1 %v1934_v8, %s2721_s18  ;;  %2201 = vrot.lane.b32.xlu0 %v1936_v12, %s2722_s22  ;;  %v2168_v41 = vpop.permute.xlu0 %2167 }
 0x321   : > { %v2285_v27 = vsel %vm1669_vm2, %v3704_v33, %v2168_v41  ;;  %v1940_v33 = vsel %vm1101_vm1, %v1924_v22, %v1939_v17  ;;  %vm1714_vm1 = vcmask 261120  }
 0x323   : > { %v1592_v35 = vpop.permute.xlu1 %1591  ;;  %v1642_v37 = vpop.permute.xlu2 %1641 }
 0x326   : > { %2223 = vrot.lane.b32.xlu2 %v3801_v25, %s2724_s24 }
 0x328   : > { %2207 = vrot.lane.b32.xlu1 %v3713_v52, %s2730_s30  ;;  %2215 = vrot.lane.b32.xlu0 %v3701_v36, %s2723_s23  ;;  %v1674_v36 = vsel %vm1672_vm3, %v1671_v53, %v3789_v54  ;;  %s2651_s30 = scalar_lea.hbm %s4186_s1, 32 }
 0x32b   : > { %v1602_v28 = vpop.permute.xlu1 %1601  ;;  %v4024_v56 = vpop.permute.xlu2 %1655 }
 0x32e   : > { %2233 = vrot.lane.b32.xlu2 %v3896_v60, %s2731_s2  ;;  %v1677_v60 = vsel %vm1675_vm4, %v1674_v36, %v3891_v55  ;;  %v1679_v55 = vsel %vm1678_vm5, %v1676_v7, %v3809_v21 }
 0x32f   : > { %v1680_v50 = vsel %vm1678_vm5, %v1677_v60, %v1578_v6 }
 0x330   : > { %2217 = vrot.lane.b32.xlu1 %v1940_v33, %s2723_s23  ;;  %2225 = vrot.lane.b32.xlu0 %v3904_v46, %s2724_s24  ;;  %v1683_v54 = vsel %vm1681_vm6, %v1680_v50, %v3826_v0  ;;  %s2342_s23 = scalar_lea.hbm %s4186_s1, %s2462_s16  ;;  %s2343_s24 = sshll.u32 %s4098_s13, 4  ;;  %s2344_s24 = int_to_ptr.vmem [resolvable:$true] %s2343_s24 }
 0x333   : > { %v1616_v52 = vpop.permute.xlu1 %1615  ;;  %v1666_v25 = vpop.permute.xlu2 %1665 }
 0x336   : > { %2247 = vrot.lane.b32.xlu2 %v3775_v58, %s2726_s26 }
 0x338   : > { %2231 = vrot.lane.b32.xlu1 %v3784_v34, %s2731_s2  ;;  %2239 = vrot.lane.b32.xlu0 %v3787_v43, %s2725_s25  ;;  %v1686_v34 = vsel %vm1684_vm7, %v1683_v54, %v3947_v9  ;;  %v1682_v43 = vsel %vm1681_vm6, %v1679_v55, %v3933_v13 }
 0x339   : > { %v1689_v19 = vsel %vm1687_vm8, %v1686_v34, %v1602_v28  ;;  %v1685_v0 = vsel %vm1684_vm7, %v1682_v43, %v1592_v35 }
 0x33a   : > { %v1692_v21 = vsel %vm1690_vm9, %v1689_v19, %v3882_v51  ;;  %v1688_v13 = vsel %vm1687_vm8, %v1685_v0, %v3850_v47 }
 0x33b   : > { %v1626_v58 = vpop.permute.xlu1 %1625  ;;  %v2176_v46 = vpop.permute.xlu2 %2175  ;;  %v1691_v57 = vsel %vm1690_vm9, %v1688_v13, %v3966_v38 }
 0x33c   : > { %v4053_v2 = vsel %vm1672_vm3, %v2285_v27, %v2176_v46 }
 0x33e   : > { %2257 = vrot.lane.b32.xlu2 %v3910_v42, %s2732_s3  ;;  %v1695_v42 = vsel %vm1693_vm10, %v1692_v21, %v3989_v11 }
 0x340   : > { %2241 = vrot.lane.b32.xlu1 %v3913_v1, %s2725_s25  ;;  %2249 = vrot.lane.b32.xlu0 %v3900_v3, %s2726_s26  ;;  %v1698_v1 = vsel %vm1696_vm11, %v1695_v42, %v1626_v58  ;;  %v1694_v3 = vsel %vm1693_vm10, %v1691_v57, %v1616_v52  ;;  %s2345_s25 = sshll.u32 %s2342_s23, 4  ;;  %s2327_s26 = scalar_lea.sflag [#allocation4], %s2820_s5  ;;  %s2346_s25 = int_to_ptr.hbm [resolvable:$true] %s2345_s25 }
 0x341   : > { %v1701_v51 = vsel %vm1699_vm12, %v1698_v1, %v3949_v61  ;;  %v1697_v47 = vsel %vm1696_vm11, %v1694_v3, %v3928_v15 }
 0x342   : > { %v1704_v11 = vsel %vm1702_vm13, %v1701_v51, %v1642_v37 }
 0x343   : > { %v1640_v9 = vpop.permute.xlu1 %1639 }
 0x346   : > { %2271 = vrot.lane.b32.xlu2 %v3778_v4, %s2728_s28  ;;  %v1700_v4 = vsel %vm1699_vm12, %v1697_v47, %v4007_v39 }
 0x348   : > { %2255 = vrot.lane.b32.xlu1 %v3792_v29, %s2732_s3  ;;  %2263 = vrot.lane.b32.xlu0 %v3781_v32, %s2727_s27  ;;  %v1703_v29 = vsel %vm1702_vm13, %v1700_v4, %v1640_v9 }
 0x349   : > { %v1706_v16 = vsel %vm1705_vm14, %v1703_v29, %v3976_v23 }
 0x34b   : > { %v1650_v38 = vpop.permute.xlu1 %1649 }
 0x34c   : > { %v1707_v61 = vsel %vm1705_vm14, %v1704_v11, %v1650_v38 }
 0x34d   : > { %v1710_v32 = vsel %vm1708_vm0, %v1707_v61, %v4000_v45 }
 0x34e   : > { %2281 = vrot.lane.b32.xlu2 %v3916_v63, %s2733_s4  ;;  %v1713_v15 = vsel %vm1711_vm15, %v1710_v32, %v1666_v25  ;;  %v1709_v63 = vsel %vm1708_vm0, %v1706_v16, %v4024_v56 }
 0x34f   : > { %1716 = vst.msk [vmem:[%s4098_s13 + $0x8] sm:$0xff] %vm1714_vm1, %v1713_v15 }
 0x350   : > { %2265 = vrot.lane.b32.xlu1 %v3907_v62, %s2727_s27  ;;  %2273 = vrot.lane.b32.xlu0 %v3926_v31, %s2728_s28  ;;  %s2645_s27 = sshra.s32 %s2346_s25, 4  ;;  %s2646_s27 = int_to_ptr.hbm [resolvable:$true] %s2645_s27 }
 0x351   : > { %s2647_s28 = scalar_lea.hbm %s2646_s27, 16  ;;  %p2652_p7 = scmp.lt.s32.totalorder %s2646_s27, %s4186_s1 }
 0x352   : > { %p2648_p4 = scmp.ne.s32.totalorder %s2646_s27, %s2647_s28  ;;  %p2653_p8 = scmp.lt.s32.totalorder %s2651_s30, %s2647_s28 }
 0x353   : > { %v1664_v22 = vpop.permute.xlu1 %1663 }
 0x354   : > { %v1712_v44 = vsel %vm1711_vm15, %v1709_v63, %v1664_v22  ;;  %p2649_p5 = pnand %p2648_p4, %p2797_p9  ;;  %p2654_p10 = por %p2653_p8, %p2652_p7 }
 0x355   : > { %1715 = vst.msk [vmem:[%s4098_s13] sm:$0xff] %vm1714_vm1, %v1712_v44 }
 0x356   : > { %p2650_p6 = pneg %p2649_p5 }
 0x358   : > { %2279 = vrot.lane.b32.xlu1 %v3770_v26, %s2733_s4  ;;  %p2655_p13 = pnand %p2654_p10, %p2650_p6 }
 0x368   : > { %v2186_v49 = vpop.permute.xlu2 %2185 }
 0x370   : > { %v2200_v48 = vpop.permute.xlu2 %2199 }
 0x378   : > { %v2210_v30 = vpop.permute.xlu2 %2209 }
 0x380   : > { %v2224_v5 = vpop.permute.xlu2 %2223 }
 0x382   : > { %v2170_v45 = vpop.permute.xlu1 %2169  ;;  %v2178_v23 = vpop.permute.xlu0 %2177 }
 0x383   : > { %v2286_v12 = vsel %vm1669_vm2, %v3986_v18, %v2170_v45  ;;  %vm2323_vm2 = vcmask 523520  }
 0x384   : > { %v2288_v26 = vsel %vm1672_vm3, %v2286_v12, %v2178_v23 }
 0x385   : > { %v2290_v35 = vsel %vm1675_vm4, %v2288_v26, %v2186_v49 }
 0x388   : > { %v2234_v59 = vpop.permute.xlu2 %2233 }
 0x38a   : > { %v2184_v20 = vpop.permute.xlu1 %2183  ;;  %v2192_v62 = vpop.permute.xlu0 %2191 }
 0x38b   : > { %v2289_v28 = vsel %vm1675_vm4, %v4053_v2, %v2184_v20 }
 0x38c   : > { %v2291_v33 = vsel %vm1678_vm5, %v2289_v28, %v2192_v62 }
 0x38d   : > { %v2293_v36 = vsel %vm1681_vm6, %v2291_v33, %v2200_v48 }
 0x390   : > { %v2248_v8 = vpop.permute.xlu2 %2247 }
 0x392   : > { %v2194_v6 = vpop.permute.xlu1 %2193  ;;  %v2202_v31 = vpop.permute.xlu0 %2201 }
 0x393   : > { %v2292_v37 = vsel %vm1678_vm5, %v2290_v35, %v2194_v6 }
 0x394   : > { %v2294_v17 = vsel %vm1681_vm6, %v2292_v37, %v2202_v31 }
 0x395   : > { %v2296_v18 = vsel %vm1684_vm7, %v2294_v17, %v2210_v30 }
 0x398   : > { %v2258_v56 = vpop.permute.xlu2 %2257 }
 0x39a   : > { %v2208_v39 = vpop.permute.xlu1 %2207  ;;  %v2216_v14 = vpop.permute.xlu0 %2215 }
 0x39b   : > { %v2295_v25 = vsel %vm1684_vm7, %v2293_v36, %v2208_v39 }
 0x39c   : > { %v2297_v50 = vsel %vm1687_vm8, %v2295_v25, %v2216_v14 }
 0x39d   : > { %v2299_v46 = vsel %vm1690_vm9, %v2297_v50, %v2224_v5 }
 0x3a0   : > { %v2272_v7 = vpop.permute.xlu2 %2271 }
 0x3a2   : > { %v2218_v24 = vpop.permute.xlu1 %2217  ;;  %v2226_v10 = vpop.permute.xlu0 %2225 }
 0x3a3   : > { %v2298_v52 = vsel %vm1687_vm8, %v2296_v18, %v2218_v24 }
 0x3a4   : > { %v2300_v60 = vsel %vm1690_vm9, %v2298_v52, %v2226_v10 }
 0x3a5   : > { %v2302_v58 = vsel %vm1693_vm10, %v2300_v60, %v2234_v59 }
 0x3a8   : > { %v2282_v57 = vpop.permute.xlu2 %2281 }
 0x3aa   : > { %v2232_v41 = vpop.permute.xlu1 %2231  ;;  %v2240_v27 = vpop.permute.xlu0 %2239 }
 0x3ab   : > { %v2301_v34 = vsel %vm1693_vm10, %v2299_v46, %v2232_v41 }
 0x3ac   : > { %v2303_v19 = vsel %vm1696_vm11, %v2301_v34, %v2240_v27 }
 0x3ad   : > { %v2305_v9 = vsel %vm1699_vm12, %v2303_v19, %v2248_v8 }
 0x3b2   : > { %v2242_v40 = vpop.permute.xlu1 %2241  ;;  %v2250_v53 = vpop.permute.xlu0 %2249 }
 0x3b3   : > { %v2304_v2 = vsel %vm1696_vm11, %v2302_v58, %v2242_v40 }
 0x3b4   : > { %v2306_v43 = vsel %vm1699_vm12, %v2304_v2, %v2250_v53 }
 0x3b5   : > { %v2308_v21 = vsel %vm1702_vm13, %v2306_v43, %v2258_v56 }
 0x3ba   : > { %v2256_v54 = vpop.permute.xlu1 %2255  ;;  %v2264_v55 = vpop.permute.xlu0 %2263 }
 0x3bb   : > { %v2307_v1 = vsel %vm1702_vm13, %v2305_v9, %v2256_v54 }
 0x3bc   : > { %v2309_v47 = vsel %vm1705_vm14, %v2307_v1, %v2264_v55 }
 0x3bd   : > { %v2311_v11 = vsel %vm1708_vm0, %v2309_v47, %v2272_v7 }
 0x3c2   : > { %v2266_v0 = vpop.permute.xlu1 %2265  ;;  %v2274_v13 = vpop.permute.xlu0 %2273 }
 0x3c3   : > { %v2310_v42 = vsel %vm1705_vm14, %v2308_v21, %v2266_v0 }
 0x3c4   : > { %v2312_v3 = vsel %vm1708_vm0, %v2310_v42, %v2274_v13 }
 0x3c5   : > { %v2314_v51 = vsel %vm1711_vm15, %v2312_v3, %v2282_v57 }
 0x3c6   : > { %2319 = vrot.lane.b32.xlu1 %v2314_v51, %s2734_s15 }
 0x3ca   : > { %v2280_v38 = vpop.permute.xlu1 %2279 }
 0x3cb   : > { %v2313_v4 = vsel %vm1711_vm15, %v2311_v11, %v2280_v38 }
 0x3cc   : > { %2317 = vrot.lane.b32.xlu0 %v2313_v4, %s2734_s15 }
 0x438   : > { %v2320_v61 = vpop.permute.xlu1 %2319 }
 0x439   : > { %2325 = vst.msk [vmem:[%s4098_s13 + $0x8] sm:$0xff] %vm2323_vm2, %v2320_v61 }
 0x43e   : > { %v2318_v29 = vpop.permute.xlu0 %2317 }
 0x43f   : > { %2324 = vst.msk [vmem:[%s4098_s13] sm:$0xff] %vm2323_vm2, %v2318_v29 }
 0x440   : > { %2658 = shalt.err (!%p2655_p13)
}
 0x441   : > { %s2735_s5 = smov 128  }
 0x442   : > { %2465 = dma.vmem_to_hbm [thread:$0]  (%p2797_p9), %s2344_s24, 256, %s2346_s25, %s2327_s26, %s2735_s5, %s2735_s5, %s2721_s18  }
 0x443 PF: > { %s2360_s4 = sand.u32 1, %s2693_s6   ;;  %p2472_p0 = pnand %p2443_p12, %p2804_p11 }
 0x444   : > { %s2361_s12 = scalar_lea.sflag [#allocation4], %s2360_s4 }
 0x445   : > { %p2473_p1 = pneg %p2472_p0 }
 0x447   : > { %2688 = dma.done.wait (%p2473_p1), %s2361_s12, 256  }
 0x448   : > { %2690 = vsyncadd (%p2473_p1), %s2361_s12, 4294967040  ;;  %s17_s11 = sadd.s32 1, %s2713_s11   ;;  %s4251_s6 = smov %s2697_s7 }
 0x449   : > { %p14_p2 = scmp.ge.s32.totalorder %s17_s11, 4   ;;  %s4252_s7 = smov %s2701_s8 }
 0x44a   : > { %s4253_s8 = smov %s2802_s20  ;;  %s4254_s9 = smov %s2709_s10 }
 0x44b   : > { %s4255_s10 = smov %s4257_s14  ;;  %16 = sbr.rel (!%p14_p2) target bundleno = 6 (0x6), region = 72 }
 0x450   :  { %2367 = vsyncpa [#allocation3], 1 }
 0x451   :  { %2369 = vsyncpa [#allocation3 + $0x1], 1 }
 0x452   :  { %2370 = vsyncpa [#allocation4], 1 }
 0x453   :  { %2372 = vsyncpa [#allocation4 + $0x1], 1 }

// kernel: tpu_custom_call.1
= control target key start
LH: loop header
LB: loop body
LE: loop exit
PB: predicated region body
PF: predicated region fallthrough
CT: control target
= control target key end

     0   :  { %6 = vsyncpa [#allocation3], 0  ;;  %s620_s0 = inlined_call_operand.hbm [shape: f32[2,4,1,256], index: 0, kind: input, shape index: {}]   ;;  %s621_s1 = inlined_call_operand.hbm [shape: f32[2,2,2,1,256], index: 1, kind: output, shape index: {}]  }
   0x1   :  { %8 = vsyncpa [#allocation3 + $0x1], 0 }
   0x2   :  { %9 = vsyncpa [#allocation4], 0 }
   0x3   :  { %11 = vsyncpa [#allocation4 + $0x1], 0  ;;  %s500_s6 = smov 0   ;;  %s502_s7 = smov 0  }
   0x4   :  { %s504_s8 = smov 0   ;;  %s506_s9 = smov 0  }
   0x5   :  { %s508_s10 = smov 0   ;;  %s510_s11 = smov 0  }
   0x6 LB: > { %s287_s12 = sadd.s32 4294967295, %s484_s11   ;;  %s288_s13 = sadd.s32 4294967294, %s484_s11   ;;  %s484_s11 = sphi %s510_s11, %s17_s11   ;;  %s480_s10 = sphi %s508_s10, %s630_s10   ;;  %s476_s9 = sphi %s506_s9, %s629_s9   ;;  %s472_s8 = sphi %s504_s8, %s628_s8   ;;  %s468_s7 = sphi %s502_s7, %s627_s7   ;;  %s464_s6 = sphi %s500_s6, %s626_s6  }
   0x7   : > { %s29_s14 = sadd.s32 1, %s480_s10  ;;  %s38_s15 = sadd.s32 1, %s472_s8 }
   0x8   : > { %p31_p0 = scmp.ge.s32.totalorder %s29_s14, 2  ;;  %p45_p1 = scmp.ne.s32.totalorder %s472_s8, %s468_s7 }
   0x9   : > { %p46_p2 = scmp.eq.s32.totalorder %s484_s11, 0  ;;  %p51_p3 = scmp.ne.s32.totalorder %s468_s7, %s464_s6 }
   0xa   : > { %s632_s14 = smov (%p31_p0, %s29_s14), 0  ;;  %p52_p5 = scmp.eq.s32.totalorder %s287_s12, 0 }
   0xb   : > { %p541_p4 = por %p46_p2, %p45_p1  ;;  %s33_s17 = ssub.s32 %s480_s10, %s632_s14 }
   0xc   : > { %p77_p6 = scmp.eq.s32.totalorder %s287_s12, 1  ;;  %p36_p7 = scmp.eq.s32.totalorder %s33_s17, 0 }
   0xd   : > { %p547_p8 = por %p52_p5, %p51_p3  ;;  %p83_p10 = scmp.eq.s32.totalorder %s288_s13, 1 }
   0xe   : > { %p551_p9 = por %p77_p6, %p45_p1  ;;  %p290_p12 = scmp.ge.s32.totalorder %s484_s11, 2 }
   0xf   : > { %s556_s20 = scalar_select %p36_p7, %s472_s8, %s38_s15  }
  0x10   : > { %p558_p11 = por %p83_p10, %p51_p3  ;;  %p318_p13 = scmp.lt.s32.totalorder %s484_s11, 2 }
  0x11   : > { %s103_s22 = sand.u32 1, %s472_s8   ;;  %s292_s24 = sshll.u32 %s480_s10, 3 }
  0x12   : > { %s291_s23 = sshll.u32 %s103_s22, 3  ;;  %s113_s27 = scalar_lea.hbm %s620_s0, %s292_s24 }
  0x13   : > { %s107_s28 = scalar_lea.vmem [#allocation2], %s291_s23  ;;  %s114_s30 = sshll.u32 %s113_s27, 4  ;;  %s115_s30 = int_to_ptr.hbm [resolvable:$true] %s114_s30 }
  0x14   : > { %s116_s29 = sshll.u32 %s107_s28, 4  ;;  %p311_p0 = pnand %p318_p13, %p541_p4  ;;  %s117_s29 = int_to_ptr.vmem [resolvable:$true] %s116_s29 }
  0x15   : > { %p293_p1 = scmp.ge.s32.totalorder %s484_s11, 1  ;;  %s104_s2 = scalar_lea.sflag [#allocation3], %s103_s22 }
  0x16   : > { %s486_s3 = smov 32   ;;  %s487_s4 = smov 2  }
  0x17   : > { %313 = dma.hbm_to_vmem [thread:$0]  (!%p311_p0), %s115_s30, 128, %s117_s29, %s104_s2, %s486_s3, %s486_s3, %s487_s4  }
  0x18   : > { %p124_p2 = scmp.lt.s32.totalorder %s484_s11, 3 }
  0x1a   : > { %p125_p3 = pnand %p293_p1, %p124_p2 }
  0x1b   : > { %s574_s5 = sand.u32 (!%p125_p3), 1, %s468_s7  }
  0x1c   : > { %128 = sbr.rel (%p125_p3) target bundleno = 50 (0x32), region = 24  ;;  %s294_s12 = sshll.u32 (!%p125_p3), %s574_s5, 3 }
  0x1d   : > { %s131_s13 = scalar_lea.sflag (!%p125_p3), [#allocation3], %s574_s5  ;;  %s134_s15 = scalar_lea.vmem (!%p125_p3), [#allocation2], %s294_s12 }
  0x21   : > { %455 = dma.done.wait (%p547_p8), %s131_s13, 128  }
  0x22   : > { %457 = vsyncadd (%p547_p8), %s131_s13, 4294967168  ;;  %s303_s16 = sshll.u32 %s476_s9, 3  ;;  %v156_v0 = vld [vmem:[%s134_s15] sm:$0x3]  ;;  %v296_v1 = vld [vmem:[%s134_s15 + $0x2] sm:$0x3]  ;;  %v174_v6 = vlaneseq }
  0x23   : > { %v297_v2 = vld [vmem:[%s134_s15 + $0x4] sm:$0x3]  ;;  %v159_v3 = vmul.f32 0.5, %v296_v1  ;;  %v298_v5 = vld [vmem:[%s134_s15 + $0x6] sm:$0x3]  ;;  %s198_s23 = scalar_lea.hbm %s621_s1, %s303_s16  ;;  %s153_s18 = scalar_lea.vmem [#allocation5], %s294_s12 }
  0x24   : > { %v162_v4 = vmul.f32 0.5, %v297_v2  ;;  %v165_v7 = vmul.f32 0.5, %v298_v5  ;;  %vm176_vm0 = vcmp.lt.s32.totalorder %v174_v6, 256  ;;  %s199_s9 = sshll.u32 %s153_s18, 4  ;;  %s201_s24 = sshll.u32 %s198_s23, 4  ;;  %s200_s9 = int_to_ptr.vmem [resolvable:$true] %s199_s9  ;;  %s202_s24 = int_to_ptr.hbm [resolvable:$true] %s201_s24 }
  0x25   : > { %v166_v8 = vadd.f32 %v159_v3, %v156_v0  ;;  %v167_v9 = vsub.f32 %v156_v0, %v159_v3  ;;  %s186_s25 = scalar_lea.sflag [#allocation4], %s574_s5  ;;  %s416_s26 = sshra.s32 %s202_s24, 4  ;;  %s417_s26 = int_to_ptr.hbm [resolvable:$true] %s416_s26 }
  0x26   : > { %v168_v10 = vadd.f32 %v165_v7, %v162_v4  ;;  %v169_v11 = vsub.f32 %v162_v4, %v165_v7  ;;  %s418_s27 = scalar_lea.hbm %s417_s26, 8  ;;  %s422_s30 = scalar_lea.hbm %s621_s1, 16 }
  0x27   : > { %p419_p4 = scmp.ne.s32.totalorder %s417_s26, %s418_s27  ;;  %p423_p7 = scmp.lt.s32.totalorder %s417_s26, %s621_s1 }
  0x28   : > { %v170_v12 = vadd.f32 %v168_v10, %v166_v8  ;;  %v171_v13 = vsub.f32 %v166_v8, %v168_v10  ;;  %v172_v14 = vadd.f32 %v169_v11, %v167_v9  ;;  %v173_v15 = vsub.f32 %v167_v9, %v169_v11  ;;  %p424_p8 = scmp.lt.s32.totalorder %s422_s30, %s418_s27 }
  0x29   : > { %p420_p5 = pnand %p419_p4, %p551_p9 }
  0x2a   : > { %178 = vst.msk [vmem:[%s153_s18] sm:$0x3] %vm176_vm0, %v170_v12  ;;  %p425_p10 = por %p424_p8, %p423_p7 }
  0x2b   : > { %299 = vst.msk [vmem:[%s153_s18 + $0x2] sm:$0x3] %vm176_vm0, %v171_v13  ;;  %p421_p6 = pneg %p420_p5 }
  0x2c   : > { %300 = vst.msk [vmem:[%s153_s18 + $0x4] sm:$0x3] %vm176_vm0, %v172_v14 }
  0x2d   : > { %301 = vst.msk [vmem:[%s153_s18 + $0x6] sm:$0x3] %vm176_vm0, %v173_v15  ;;  %p426_p13 = pnand %p425_p10, %p421_p6 }
  0x2f   : > { %429 = shalt.err (!%p426_p13)
}
  0x30   : > { %s488_s4 = smov 32   ;;  %s489_s5 = smov 2  }
  0x31   : > { %308 = dma.vmem_to_hbm [thread:$0]  (%p551_p9), %s200_s9, 128, %s202_s24, %s186_s25, %s488_s4, %s488_s4, %s489_s5  }
  0x32 PF: > { %s216_s12 = sand.u32 1, %s464_s6   ;;  %p315_p0 = pnand %p290_p12, %p558_p11 }
  0x33   : > { %s217_s13 = scalar_lea.sflag [#allocation4], %s216_s12 }
  0x34   : > { %p316_p1 = pneg %p315_p0 }
  0x36   : > { %459 = dma.done.wait (%p316_p1), %s217_s13, 128  }
  0x37   : > { %461 = vsyncadd (%p316_p1), %s217_s13, 4294967168  ;;  %s17_s11 = sadd.s32 1, %s484_s11   ;;  %s626_s6 = smov %s468_s7 }
  0x38   : > { %p14_p2 = scmp.ge.s32.totalorder %s17_s11, 4   ;;  %s627_s7 = smov %s472_s8 }
  0x39   : > { %s628_s8 = smov %s556_s20  ;;  %s629_s9 = smov %s480_s10 }
  0x3a   : > { %s630_s10 = smov %s632_s14  ;;  %16 = sbr.rel (!%p14_p2) target bundleno = 6 (0x6), region = 75 }
  0x3f   :  { %223 = vsyncpa [#allocation3], 1 }
  0x40   :  { %225 = vsyncpa [#allocation3 + $0x1], 1 }
  0x41   :  { %226 = vsyncpa [#allocation4], 1 }
  0x42   :  { %228 = vsyncpa [#allocation4 + $0x1], 1 }

</bundles_post_ra>
